<compile_context>
chip_gen: v6e
topology: v6e:2x2x1
jax: 0.10.0
libtpu: 0.0.40
codegen_flags: <defaults>
</compile_context>

<pallas_src>
import jax
import jax.numpy as jnp
from jax.experimental import pallas as pl
from jax.experimental.pallas import tpu as pltpu

INPUT_SIZE = 7
HIDDEN = 64
NUM_LAYERS = 2  # hard-coded: layer-1 and layer-2 weights passed separately


def lstm_kernel(x_ref,                       # (T*B, I)   time-major, flattened
                wih1_ref, whh1_ref, b1_ref,  # layer 1: (I,4H), (H,4H), (1,4H)
                wih2_ref, whh2_ref, b2_ref,  # layer 2: (H,4H), (H,4H), (1,4H)
                out_ref,                     # (B, H)     final h of layer 2
                xp1_ref, xp2_ref, hseq_ref): # VMEM scratch
    H = HIDDEN
    B = out_ref.shape[0]
    TB = x_ref.shape[0]
    T = TB // B

    # ---- layer-1 input projection for all T steps: one big MXU matmul ----
    xp1_ref[...] = (
        jnp.dot(x_ref[...], wih1_ref[...], preferred_element_type=jnp.float32)
        + b1_ref[...])

    def run_layer(xp_ref, whh, store_seq):
        """Sequential recurrence; only h @ W_hh remains per step."""
        h = jnp.zeros((B, H), jnp.float32)
        c = jnp.zeros((B, H), jnp.float32)
        for t in range(T):            # T is static -> fully unrolled, static slices
            z = (xp_ref[pl.ds(t * B, B), :]
                 + jnp.dot(h, whh, preferred_element_type=jnp.float32))
            # PyTorch gate order: i, f, g, o.
            # NOTE: 64-lane gate slices split a 128-lane vreg (minor XLU cost);
            # kept for clarity per perf review ("minor in absolute terms").
            i_g = jax.nn.sigmoid(z[:, 0 * H:1 * H])
            f_g = jax.nn.sigmoid(z[:, 1 * H:2 * H])
            g_g = jnp.tanh(z[:, 2 * H:3 * H])
            o_g = jax.nn.sigmoid(z[:, 3 * H:4 * H])
            c = f_g * c + i_g * g_g
            h = o_g * jnp.tanh(c)
            if store_seq:
                hseq_ref[pl.ds(t * B, B), :] = h
        return h

    # ---- layer 1 recurrence (stores full h1 sequence for layer 2) ----
    run_layer(xp1_ref, whh1_ref[...], store_seq=True)

    # ---- layer-2 input projection from the whole h1 sequence ----
    xp2_ref[...] = (
        jnp.dot(hseq_ref[...], wih2_ref[...], preferred_element_type=jnp.float32)
        + b2_ref[...])

    # ---- layer 2 recurrence ----
    h2 = run_layer(xp2_ref, whh2_ref[...], store_seq=False)
    out_ref[...] = h2


def lstm_forward(x, params):
    """x: (B, T, INPUT_SIZE) float32 (batch_first, like PyTorch). Returns (B, 1)."""
    B, T, I = x.shape
    H = HIDDEN
    B_pad = max(8, ((B + 7) // 8) * 8)      # fill all 8 sublanes of each vreg

    (wih1_t, whh1_t, b1, wih2_t, whh2_t, b2, wout_t, bout) = params

    # Pad batch, go time-major, flatten to (T*B_pad, I) for the big projection.
    x_p = jnp.pad(x, ((0, B_pad - B), (0, 0), (0, 0)))
    x_tm = jnp.transpose(x_p, (1, 0, 2))            # (T, B_pad, I)
    x2d = x_tm.reshape(T * B_pad, I)                # (T*B_pad, I)

    def full_spec(arr):
        nd = arr.ndim
        return pl.BlockSpec(arr.shape, lambda i, nd=nd: (0,) * nd)

    grid_spec = pltpu.PrefetchScalarGridSpec(
        num_scalar_prefetch=0,
        grid=(1,),                                   # single grid point: whole
        in_specs=[full_spec(a) for a in              # problem is VMEM-resident
                  (x2d, wih1_t, whh1_t, b1, wih2_t, whh2_t, b2)],
        out_specs=pl.BlockSpec((B_pad, H), lambda i: (0, 0)),
        scratch_shapes=[
            pltpu.VMEM((T * B_pad, 4 * H), jnp.float32),  # layer-1 projections
            pltpu.VMEM((T * B_pad, 4 * H), jnp.float32),  # layer-2 projections
            pltpu.VMEM((T * B_pad, H), jnp.float32),      # h1 sequence
        ],
    )

    h2 = pl.pallas_call(
        lstm_kernel,
        out_shape=jax.ShapeDtypeStruct((B_pad, H), jnp.float32),
        grid_spec=grid_spec,
        compiler_params=pltpu.CompilerParams(
            dimension_semantics=("arbitrary",)),
    )(x2d, wih1_t, whh1_t, b1, wih2_t, whh2_t, b2)

    # Linear(64 -> 1) head in the wrapper (runs once; only real batch rows).
    return h2[:B] @ wout_t + bout


def init_params(key):
    """Deterministic init matching PyTorch shapes: uniform(-1/sqrt(H), 1/sqrt(H))."""
    H, I = HIDDEN, INPUT_SIZE
    k = 1.0 / jnp.sqrt(jnp.float32(H))
    keys = jax.random.split(key, 10)

    def u(kk, shape):
        return jax.random.uniform(kk, shape, jnp.float32, -k, k)

    # nn.LSTM layer 0: weight_ih (4H, I), weight_hh (4H, H), biases (4H,)
    w_ih1 = u(keys[0], (4 * H, I))
    w_hh1 = u(keys[1], (4 * H, H))
    b1 = u(keys[2], (4 * H,)) + u(keys[3], (4 * H,))      # b_ih + b_hh folded
    # nn.LSTM layer 1: weight_ih (4H, H), weight_hh (4H, H), biases (4H,)
    w_ih2 = u(keys[4], (4 * H, H))
    w_hh2 = u(keys[5], (4 * H, H))
    b2 = u(keys[6], (4 * H,)) + u(keys[7], (4 * H,))
    # nn.Linear(64, 1): weight (1, H), bias (1,)
    w_out = u(keys[8], (1, H))
    b_out = u(keys[9], (1,))

    # Pre-transpose for (B, in) @ (in, out) matmuls inside the kernel.
    return (w_ih1.T, w_hh1.T, b1.reshape(1, 4 * H),
            w_ih2.T, w_hh2.T, b2.reshape(1, 4 * H),
            w_out.T, b_out.reshape(1, 1))


def lstm_reference(x, params):
    """Pure-JAX reference (lax.scan) with identical semantics, for validation."""
    (wih1_t, whh1_t, b1, wih2_t, whh2_t, b2, wout_t, bout) = params
    B = x.shape[0]
    H = HIDDEN

    def cell(xt, h, c, wih_t, whh_t, b):
        z = xt @ wih_t + h @ whh_t + b
        i = jax.nn.sigmoid(z[:, 0 * H:1 * H])
        f = jax.nn.sigmoid(z[:, 1 * H:2 * H])
        g = jnp.tanh(z[:, 2 * H:3 * H])
        o = jax.nn.sigmoid(z[:, 3 * H:4 * H])
        c = f * c + i * g
        return o * jnp.tanh(c), c

    def step(carry, xt):
        h1, c1, h2, c2 = carry
        h1, c1 = cell(xt, h1, c1, wih1_t, whh1_t, b1)
        h2, c2 = cell(h1, h2, c2, wih2_t, whh2_t, b2)
        return (h1, c1, h2, c2), None

    init = tuple(jnp.zeros((B, H), jnp.float32) for _ in range(4))
    (h1, c1, h2, c2), _ = jax.lax.scan(step, init, jnp.transpose(x, (1, 0, 2)))
    return h2 @ wout_t + bout


if __name__ == "__main__":
    B, T = 2, 8
    key = jax.random.PRNGKey(0)
    kx, kp = jax.random.split(key)
    x = jax.random.normal(kx, (B, T, INPUT_SIZE), jnp.float32)
    params = init_params(kp)

    out = jax.jit(lstm_forward)(x, params)
    out = jax.block_until_ready(out)

    ref = lstm_reference(x, params)
    assert out.shape == (B, 1)
    assert jnp.allclose(out, ref, atol=1e-4, rtol=1e-4), (out, ref)

    print("KERNEL_OK")
</pallas_src>

<mosaic_0001>
module attributes {stable_mosaic.version = 11 : i64} {
  func.func @lstm_kernel(%arg0: i32, %arg1: memref<64x7xf32, #tpu.memory_space<vmem>>, %arg2: memref<7x256xf32, #tpu.memory_space<vmem>>, %arg3: memref<64x256xf32, #tpu.memory_space<vmem>>, %arg4: memref<1x256xf32, #tpu.memory_space<vmem>>, %arg5: memref<64x256xf32, #tpu.memory_space<vmem>>, %arg6: memref<64x256xf32, #tpu.memory_space<vmem>>, %arg7: memref<1x256xf32, #tpu.memory_space<vmem>>, %arg8: memref<8x64xf32, #tpu.memory_space<vmem>>, %arg9: memref<64x256xf32, #tpu.memory_space<vmem>>, %arg10: memref<64x256xf32, #tpu.memory_space<vmem>>, %arg11: memref<64x64xf32, #tpu.memory_space<vmem>>) attributes {dimension_semantics = [#tpu.dimension_semantics<arbitrary>], iteration_bounds = array<i64: 1>, scalar_prefetch = 0 : i64, scratch_operands = 3 : i64, tpu.core_type = #tpu.core_type<tc>, window_params = [{pipeline_mode = #tpu.pipeline_mode<synchronous>, transform_indices = @transform_0, window_bounds = array<i64: 64, 7>}, {pipeline_mode = #tpu.pipeline_mode<synchronous>, transform_indices = @transform_1, window_bounds = array<i64: 7, 256>}, {pipeline_mode = #tpu.pipeline_mode<synchronous>, transform_indices = @transform_2, window_bounds = array<i64: 64, 256>}, {pipeline_mode = #tpu.pipeline_mode<synchronous>, transform_indices = @transform_3, window_bounds = array<i64: 1, 256>}, {pipeline_mode = #tpu.pipeline_mode<synchronous>, transform_indices = @transform_4, window_bounds = array<i64: 64, 256>}, {pipeline_mode = #tpu.pipeline_mode<synchronous>, transform_indices = @transform_5, window_bounds = array<i64: 64, 256>}, {pipeline_mode = #tpu.pipeline_mode<synchronous>, transform_indices = @transform_6, window_bounds = array<i64: 1, 256>}, {pipeline_mode = #tpu.pipeline_mode<synchronous>, transform_indices = @transform_7, window_bounds = array<i64: 8, 64>}]} {
    %c0 = arith.constant 0 : index
    %c0_0 = arith.constant 0 : index
    %0 = vector.load %arg1[%c0, %c0_0] : memref<64x7xf32, #tpu.memory_space<vmem>>, vector<64x7xf32>
    %c0_1 = arith.constant 0 : index
    %c0_2 = arith.constant 0 : index
    %1 = vector.load %arg2[%c0_1, %c0_2] : memref<7x256xf32, #tpu.memory_space<vmem>>, vector<7x256xf32>
    %cst = arith.constant dense<0.000000e+00> : vector<64x256xf32>
    %2 = tpu.matmul %0, %1, %cst {dimension_numbers = #tpu.dot_dimension_numbers<[1], [0], [0], [1], [0, 0, 1, 1], [], []>} : vector<64x7xf32>, vector<7x256xf32>, vector<64x256xf32> -> vector<64x256xf32>
    %c0_3 = arith.constant 0 : index
    %c0_4 = arith.constant 0 : index
    %3 = vector.load %arg4[%c0_3, %c0_4] : memref<1x256xf32, #tpu.memory_space<vmem>>, vector<1x256xf32>
    %4 = vector.broadcast %3 : vector<1x256xf32> to vector<64x256xf32>
    %5 = arith.addf %2, %4 : vector<64x256xf32>
    %c0_5 = arith.constant 0 : index
    %c0_6 = arith.constant 0 : index
    %6 = vector.load %arg9[%c0_5, %c0_6] : memref<64x256xf32, #tpu.memory_space<vmem>>, vector<64x256xf32>
    tpu.vector_store %arg9[%c0_5, %c0_6], %5 {strides = array<i32>} : memref<64x256xf32, #tpu.memory_space<vmem>>, vector<64x256xf32>,
    %c0_7 = arith.constant 0 : index
    %c0_8 = arith.constant 0 : index
    %7 = vector.load %arg3[%c0_7, %c0_8] : memref<64x256xf32, #tpu.memory_space<vmem>>, vector<64x256xf32>
    %cst_9 = arith.constant 0.000000e+00 : f32
    %8 = vector.broadcast %cst_9 : f32 to vector<8x64xf32>
    %cst_10 = arith.constant 0.000000e+00 : f32
    %9 = vector.broadcast %cst_10 : f32 to vector<8x64xf32>
    %c0_11 = arith.constant 0 : index
    %c0_12 = arith.constant 0 : index
    %10 = vector.load %arg9[%c0_11, %c0_12] : memref<64x256xf32, #tpu.memory_space<vmem>>, vector<8x256xf32>
    %cst_13 = arith.constant dense<0.000000e+00> : vector<8x256xf32>
    %11 = tpu.matmul %8, %7, %cst_13 {dimension_numbers = #tpu.dot_dimension_numbers<[1], [0], [0], [1], [0, 0, 1, 1], [], []>} : vector<8x64xf32>, vector<64x256xf32>, vector<8x256xf32> -> vector<8x256xf32>
    %12 = arith.addf %10, %11 : vector<8x256xf32>
    %13 = vector.extract_strided_slice %12 {offsets = [0, 0], sizes = [8, 64], strides = [1, 1]} : vector<8x256xf32> to vector<8x64xf32>
    %14 = arith.negf %13 : vector<8x64xf32>
    %15 = math.exp %14 : vector<8x64xf32>
    %cst_14 = arith.constant 1.000000e+00 : f32
    %16 = vector.broadcast %cst_14 : f32 to vector<8x64xf32>
    %17 = arith.addf %16, %15 : vector<8x64xf32>
    %18 = arith.divf %16, %17 : vector<8x64xf32>
    %19 = vector.extract_strided_slice %12 {offsets = [0, 64], sizes = [8, 64], strides = [1, 1]} : vector<8x256xf32> to vector<8x64xf32>
    %20 = arith.negf %19 : vector<8x64xf32>
    %21 = math.exp %20 : vector<8x64xf32>
    %cst_15 = arith.constant 1.000000e+00 : f32
    %22 = vector.broadcast %cst_15 : f32 to vector<8x64xf32>
    %23 = arith.addf %22, %21 : vector<8x64xf32>
    %24 = arith.divf %22, %23 : vector<8x64xf32>
    %25 = vector.extract_strided_slice %12 {offsets = [0, 128], sizes = [8, 64], strides = [1, 1]} : vector<8x256xf32> to vector<8x64xf32>
    %26 = math.tanh %25 : vector<8x64xf32>
    %27 = vector.extract_strided_slice %12 {offsets = [0, 192], sizes = [8, 64], strides = [1, 1]} : vector<8x256xf32> to vector<8x64xf32>
    %28 = arith.negf %27 : vector<8x64xf32>
    %29 = math.exp %28 : vector<8x64xf32>
    %cst_16 = arith.constant 1.000000e+00 : f32
    %30 = vector.broadcast %cst_16 : f32 to vector<8x64xf32>
    %31 = arith.addf %30, %29 : vector<8x64xf32>
    %32 = arith.divf %30, %31 : vector<8x64xf32>
    %33 = arith.mulf %24, %9 : vector<8x64xf32>
    %34 = arith.mulf %18, %26 : vector<8x64xf32>
    %35 = arith.addf %33, %34 : vector<8x64xf32>
    %36 = math.tanh %35 : vector<8x64xf32>
    %37 = arith.mulf %32, %36 : vector<8x64xf32>
    %c0_17 = arith.constant 0 : index
    %c0_18 = arith.constant 0 : index
    %38 = vector.load %arg11[%c0_17, %c0_18] : memref<64x64xf32, #tpu.memory_space<vmem>>, vector<8x64xf32>
    tpu.vector_store %arg11[%c0_17, %c0_18], %37 {strides = array<i32>} : memref<64x64xf32, #tpu.memory_space<vmem>>, vector<8x64xf32>,
    %c8 = arith.constant 8 : index
    %c0_19 = arith.constant 0 : index
    %39 = vector.load %arg9[%c8, %c0_19] : memref<64x256xf32, #tpu.memory_space<vmem>>, vector<8x256xf32>
    %cst_20 = arith.constant dense<0.000000e+00> : vector<8x256xf32>
    %40 = tpu.matmul %37, %7, %cst_20 {dimension_numbers = #tpu.dot_dimension_numbers<[1], [0], [0], [1], [0, 0, 1, 1], [], []>} : vector<8x64xf32>, vector<64x256xf32>, vector<8x256xf32> -> vector<8x256xf32>
    %41 = arith.addf %39, %40 : vector<8x256xf32>
    %42 = vector.extract_strided_slice %41 {offsets = [0, 0], sizes = [8, 64], strides = [1, 1]} : vector<8x256xf32> to vector<8x64xf32>
    %43 = arith.negf %42 : vector<8x64xf32>
    %44 = math.exp %43 : vector<8x64xf32>
    %cst_21 = arith.constant 1.000000e+00 : f32
    %45 = vector.broadcast %cst_21 : f32 to vector<8x64xf32>
    %46 = arith.addf %45, %44 : vector<8x64xf32>
    %47 = arith.divf %45, %46 : vector<8x64xf32>
    %48 = vector.extract_strided_slice %41 {offsets = [0, 64], sizes = [8, 64], strides = [1, 1]} : vector<8x256xf32> to vector<8x64xf32>
    %49 = arith.negf %48 : vector<8x64xf32>
    %50 = math.exp %49 : vector<8x64xf32>
    %cst_22 = arith.constant 1.000000e+00 : f32
    %51 = vector.broadcast %cst_22 : f32 to vector<8x64xf32>
    %52 = arith.addf %51, %50 : vector<8x64xf32>
    %53 = arith.divf %51, %52 : vector<8x64xf32>
    %54 = vector.extract_strided_slice %41 {offsets = [0, 128], sizes = [8, 64], strides = [1, 1]} : vector<8x256xf32> to vector<8x64xf32>
    %55 = math.tanh %54 : vector<8x64xf32>
    %56 = vector.extract_strided_slice %41 {offsets = [0, 192], sizes = [8, 64], strides = [1, 1]} : vector<8x256xf32> to vector<8x64xf32>
    %57 = arith.negf %56 : vector<8x64xf32>
    %58 = math.exp %57 : vector<8x64xf32>
    %cst_23 = arith.constant 1.000000e+00 : f32
    %59 = vector.broadcast %cst_23 : f32 to vector<8x64xf32>
    %60 = arith.addf %59, %58 : vector<8x64xf32>
    %61 = arith.divf %59, %60 : vector<8x64xf32>
    %62 = arith.mulf %53, %35 : vector<8x64xf32>
    %63 = arith.mulf %47, %55 : vector<8x64xf32>
    %64 = arith.addf %62, %63 : vector<8x64xf32>
    %65 = math.tanh %64 : vector<8x64xf32>
    %66 = arith.mulf %61, %65 : vector<8x64xf32>
    %c8_24 = arith.constant 8 : index
    %c0_25 = arith.constant 0 : index
    %67 = vector.load %arg11[%c8_24, %c0_25] : memref<64x64xf32, #tpu.memory_space<vmem>>, vector<8x64xf32>
    tpu.vector_store %arg11[%c8_24, %c0_25], %66 {strides = array<i32>} : memref<64x64xf32, #tpu.memory_space<vmem>>, vector<8x64xf32>,
    %c16 = arith.constant 16 : index
    %c0_26 = arith.constant 0 : index
    %68 = vector.load %arg9[%c16, %c0_26] : memref<64x256xf32, #tpu.memory_space<vmem>>, vector<8x256xf32>
    %cst_27 = arith.constant dense<0.000000e+00> : vector<8x256xf32>
    %69 = tpu.matmul %66, %7, %cst_27 {dimension_numbers = #tpu.dot_dimension_numbers<[1], [0], [0], [1], [0, 0, 1, 1], [], []>} : vector<8x64xf32>, vector<64x256xf32>, vector<8x256xf32> -> vector<8x256xf32>
    %70 = arith.addf %68, %69 : vector<8x256xf32>
    %71 = vector.extract_strided_slice %70 {offsets = [0, 0], sizes = [8, 64], strides = [1, 1]} : vector<8x256xf32> to vector<8x64xf32>
    %72 = arith.negf %71 : vector<8x64xf32>
    %73 = math.exp %72 : vector<8x64xf32>
    %cst_28 = arith.constant 1.000000e+00 : f32
    %74 = vector.broadcast %cst_28 : f32 to vector<8x64xf32>
    %75 = arith.addf %74, %73 : vector<8x64xf32>
    %76 = arith.divf %74, %75 : vector<8x64xf32>
    %77 = vector.extract_strided_slice %70 {offsets = [0, 64], sizes = [8, 64], strides = [1, 1]} : vector<8x256xf32> to vector<8x64xf32>
    %78 = arith.negf %77 : vector<8x64xf32>
    %79 = math.exp %78 : vector<8x64xf32>
    %cst_29 = arith.constant 1.000000e+00 : f32
    %80 = vector.broadcast %cst_29 : f32 to vector<8x64xf32>
    %81 = arith.addf %80, %79 : vector<8x64xf32>
    %82 = arith.divf %80, %81 : vector<8x64xf32>
    %83 = vector.extract_strided_slice %70 {offsets = [0, 128], sizes = [8, 64], strides = [1, 1]} : vector<8x256xf32> to vector<8x64xf32>
    %84 = math.tanh %83 : vector<8x64xf32>
    %85 = vector.extract_strided_slice %70 {offsets = [0, 192], sizes = [8, 64], strides = [1, 1]} : vector<8x256xf32> to vector<8x64xf32>
    %86 = arith.negf %85 : vector<8x64xf32>
    %87 = math.exp %86 : vector<8x64xf32>
    %cst_30 = arith.constant 1.000000e+00 : f32
    %88 = vector.broadcast %cst_30 : f32 to vector<8x64xf32>
    %89 = arith.addf %88, %87 : vector<8x64xf32>
    %90 = arith.divf %88, %89 : vector<8x64xf32>
    %91 = arith.mulf %82, %64 : vector<8x64xf32>
    %92 = arith.mulf %76, %84 : vector<8x64xf32>
    %93 = arith.addf %91, %92 : vector<8x64xf32>
    %94 = math.tanh %93 : vector<8x64xf32>
    %95 = arith.mulf %90, %94 : vector<8x64xf32>
    %c16_31 = arith.constant 16 : index
    %c0_32 = arith.constant 0 : index
    %96 = vector.load %arg11[%c16_31, %c0_32] : memref<64x64xf32, #tpu.memory_space<vmem>>, vector<8x64xf32>
    tpu.vector_store %arg11[%c16_31, %c0_32], %95 {strides = array<i32>} : memref<64x64xf32, #tpu.memory_space<vmem>>, vector<8x64xf32>,
    %c24 = arith.constant 24 : index
    %c0_33 = arith.constant 0 : index
    %97 = vector.load %arg9[%c24, %c0_33] : memref<64x256xf32, #tpu.memory_space<vmem>>, vector<8x256xf32>
    %cst_34 = arith.constant dense<0.000000e+00> : vector<8x256xf32>
    %98 = tpu.matmul %95, %7, %cst_34 {dimension_numbers = #tpu.dot_dimension_numbers<[1], [0], [0], [1], [0, 0, 1, 1], [], []>} : vector<8x64xf32>, vector<64x256xf32>, vector<8x256xf32> -> vector<8x256xf32>
    %99 = arith.addf %97, %98 : vector<8x256xf32>
    %100 = vector.extract_strided_slice %99 {offsets = [0, 0], sizes = [8, 64], strides = [1, 1]} : vector<8x256xf32> to vector<8x64xf32>
    %101 = arith.negf %100 : vector<8x64xf32>
    %102 = math.exp %101 : vector<8x64xf32>
    %cst_35 = arith.constant 1.000000e+00 : f32
    %103 = vector.broadcast %cst_35 : f32 to vector<8x64xf32>
    %104 = arith.addf %103, %102 : vector<8x64xf32>
    %105 = arith.divf %103, %104 : vector<8x64xf32>
    %106 = vector.extract_strided_slice %99 {offsets = [0, 64], sizes = [8, 64], strides = [1, 1]} : vector<8x256xf32> to vector<8x64xf32>
    %107 = arith.negf %106 : vector<8x64xf32>
    %108 = math.exp %107 : vector<8x64xf32>
    %cst_36 = arith.constant 1.000000e+00 : f32
    %109 = vector.broadcast %cst_36 : f32 to vector<8x64xf32>
    %110 = arith.addf %109, %108 : vector<8x64xf32>
    %111 = arith.divf %109, %110 : vector<8x64xf32>
    %112 = vector.extract_strided_slice %99 {offsets = [0, 128], sizes = [8, 64], strides = [1, 1]} : vector<8x256xf32> to vector<8x64xf32>
    %113 = math.tanh %112 : vector<8x64xf32>
    %114 = vector.extract_strided_slice %99 {offsets = [0, 192], sizes = [8, 64], strides = [1, 1]} : vector<8x256xf32> to vector<8x64xf32>
    %115 = arith.negf %114 : vector<8x64xf32>
    %116 = math.exp %115 : vector<8x64xf32>
    %cst_37 = arith.constant 1.000000e+00 : f32
    %117 = vector.broadcast %cst_37 : f32 to vector<8x64xf32>
    %118 = arith.addf %117, %116 : vector<8x64xf32>
    %119 = arith.divf %117, %118 : vector<8x64xf32>
    %120 = arith.mulf %111, %93 : vector<8x64xf32>
    %121 = arith.mulf %105, %113 : vector<8x64xf32>
    %122 = arith.addf %120, %121 : vector<8x64xf32>
    %123 = math.tanh %122 : vector<8x64xf32>
    %124 = arith.mulf %119, %123 : vector<8x64xf32>
    %c24_38 = arith.constant 24 : index
    %c0_39 = arith.constant 0 : index
    %125 = vector.load %arg11[%c24_38, %c0_39] : memref<64x64xf32, #tpu.memory_space<vmem>>, vector<8x64xf32>
    tpu.vector_store %arg11[%c24_38, %c0_39], %124 {strides = array<i32>} : memref<64x64xf32, #tpu.memory_space<vmem>>, vector<8x64xf32>,
    %c32 = arith.constant 32 : index
    %c0_40 = arith.constant 0 : index
    %126 = vector.load %arg9[%c32, %c0_40] : memref<64x256xf32, #tpu.memory_space<vmem>>, vector<8x256xf32>
    %cst_41 = arith.constant dense<0.000000e+00> : vector<8x256xf32>
    %127 = tpu.matmul %124, %7, %cst_41 {dimension_numbers = #tpu.dot_dimension_numbers<[1], [0], [0], [1], [0, 0, 1, 1], [], []>} : vector<8x64xf32>, vector<64x256xf32>, vector<8x256xf32> -> vector<8x256xf32>
    %128 = arith.addf %126, %127 : vector<8x256xf32>
    %129 = vector.extract_strided_slice %128 {offsets = [0, 0], sizes = [8, 64], strides = [1, 1]} : vector<8x256xf32> to vector<8x64xf32>
    %130 = arith.negf %129 : vector<8x64xf32>
    %131 = math.exp %130 : vector<8x64xf32>
    %cst_42 = arith.constant 1.000000e+00 : f32
    %132 = vector.broadcast %cst_42 : f32 to vector<8x64xf32>
    %133 = arith.addf %132, %131 : vector<8x64xf32>
    %134 = arith.divf %132, %133 : vector<8x64xf32>
    %135 = vector.extract_strided_slice %128 {offsets = [0, 64], sizes = [8, 64], strides = [1, 1]} : vector<8x256xf32> to vector<8x64xf32>
    %136 = arith.negf %135 : vector<8x64xf32>
    %137 = math.exp %136 : vector<8x64xf32>
    %cst_43 = arith.constant 1.000000e+00 : f32
    %138 = vector.broadcast %cst_43 : f32 to vector<8x64xf32>
    %139 = arith.addf %138, %137 : vector<8x64xf32>
    %140 = arith.divf %138, %139 : vector<8x64xf32>
    %141 = vector.extract_strided_slice %128 {offsets = [0, 128], sizes = [8, 64], strides = [1, 1]} : vector<8x256xf32> to vector<8x64xf32>
    %142 = math.tanh %141 : vector<8x64xf32>
    %143 = vector.extract_strided_slice %128 {offsets = [0, 192], sizes = [8, 64], strides = [1, 1]} : vector<8x256xf32> to vector<8x64xf32>
    %144 = arith.negf %143 : vector<8x64xf32>
    %145 = math.exp %144 : vector<8x64xf32>
    %cst_44 = arith.constant 1.000000e+00 : f32
    %146 = vector.broadcast %cst_44 : f32 to vector<8x64xf32>
    %147 = arith.addf %146, %145 : vector<8x64xf32>
    %148 = arith.divf %146, %147 : vector<8x64xf32>
    %149 = arith.mulf %140, %122 : vector<8x64xf32>
    %150 = arith.mulf %134, %142 : vector<8x64xf32>
    %151 = arith.addf %149, %150 : vector<8x64xf32>
    %152 = math.tanh %151 : vector<8x64xf32>
    %153 = arith.mulf %148, %152 : vector<8x64xf32>
    %c32_45 = arith.constant 32 : index
    %c0_46 = arith.constant 0 : index
    %154 = vector.load %arg11[%c32_45, %c0_46] : memref<64x64xf32, #tpu.memory_space<vmem>>, vector<8x64xf32>
    tpu.vector_store %arg11[%c32_45, %c0_46], %153 {strides = array<i32>} : memref<64x64xf32, #tpu.memory_space<vmem>>, vector<8x64xf32>,
    %c40 = arith.constant 40 : index
    %c0_47 = arith.constant 0 : index
    %155 = vector.load %arg9[%c40, %c0_47] : memref<64x256xf32, #tpu.memory_space<vmem>>, vector<8x256xf32>
    %cst_48 = arith.constant dense<0.000000e+00> : vector<8x256xf32>
    %156 = tpu.matmul %153, %7, %cst_48 {dimension_numbers = #tpu.dot_dimension_numbers<[1], [0], [0], [1], [0, 0, 1, 1], [], []>} : vector<8x64xf32>, vector<64x256xf32>, vector<8x256xf32> -> vector<8x256xf32>
    %157 = arith.addf %155, %156 : vector<8x256xf32>
    %158 = vector.extract_strided_slice %157 {offsets = [0, 0], sizes = [8, 64], strides = [1, 1]} : vector<8x256xf32> to vector<8x64xf32>
    %159 = arith.negf %158 : vector<8x64xf32>
    %160 = math.exp %159 : vector<8x64xf32>
    %cst_49 = arith.constant 1.000000e+00 : f32
    %161 = vector.broadcast %cst_49 : f32 to vector<8x64xf32>
    %162 = arith.addf %161, %160 : vector<8x64xf32>
    %163 = arith.divf %161, %162 : vector<8x64xf32>
    %164 = vector.extract_strided_slice %157 {offsets = [0, 64], sizes = [8, 64], strides = [1, 1]} : vector<8x256xf32> to vector<8x64xf32>
    %165 = arith.negf %164 : vector<8x64xf32>
    %166 = math.exp %165 : vector<8x64xf32>
    %cst_50 = arith.constant 1.000000e+00 : f32
    %167 = vector.broadcast %cst_50 : f32 to vector<8x64xf32>
    %168 = arith.addf %167, %166 : vector<8x64xf32>
    %169 = arith.divf %167, %168 : vector<8x64xf32>
    %170 = vector.extract_strided_slice %157 {offsets = [0, 128], sizes = [8, 64], strides = [1, 1]} : vector<8x256xf32> to vector<8x64xf32>
    %171 = math.tanh %170 : vector<8x64xf32>
    %172 = vector.extract_strided_slice %157 {offsets = [0, 192], sizes = [8, 64], strides = [1, 1]} : vector<8x256xf32> to vector<8x64xf32>
    %173 = arith.negf %172 : vector<8x64xf32>
    %174 = math.exp %173 : vector<8x64xf32>
    %cst_51 = arith.constant 1.000000e+00 : f32
    %175 = vector.broadcast %cst_51 : f32 to vector<8x64xf32>
    %176 = arith.addf %175, %174 : vector<8x64xf32>
    %177 = arith.divf %175, %176 : vector<8x64xf32>
    %178 = arith.mulf %169, %151 : vector<8x64xf32>
    %179 = arith.mulf %163, %171 : vector<8x64xf32>
    %180 = arith.addf %178, %179 : vector<8x64xf32>
    %181 = math.tanh %180 : vector<8x64xf32>
    %182 = arith.mulf %177, %181 : vector<8x64xf32>
    %c40_52 = arith.constant 40 : index
    %c0_53 = arith.constant 0 : index
    %183 = vector.load %arg11[%c40_52, %c0_53] : memref<64x64xf32, #tpu.memory_space<vmem>>, vector<8x64xf32>
    tpu.vector_store %arg11[%c40_52, %c0_53], %182 {strides = array<i32>} : memref<64x64xf32, #tpu.memory_space<vmem>>, vector<8x64xf32>,
    %c48 = arith.constant 48 : index
    %c0_54 = arith.constant 0 : index
    %184 = vector.load %arg9[%c48, %c0_54] : memref<64x256xf32, #tpu.memory_space<vmem>>, vector<8x256xf32>
    %cst_55 = arith.constant dense<0.000000e+00> : vector<8x256xf32>
    %185 = tpu.matmul %182, %7, %cst_55 {dimension_numbers = #tpu.dot_dimension_numbers<[1], [0], [0], [1], [0, 0, 1, 1], [], []>} : vector<8x64xf32>, vector<64x256xf32>, vector<8x256xf32> -> vector<8x256xf32>
    %186 = arith.addf %184, %185 : vector<8x256xf32>
    %187 = vector.extract_strided_slice %186 {offsets = [0, 0], sizes = [8, 64], strides = [1, 1]} : vector<8x256xf32> to vector<8x64xf32>
    %188 = arith.negf %187 : vector<8x64xf32>
    %189 = math.exp %188 : vector<8x64xf32>
    %cst_56 = arith.constant 1.000000e+00 : f32
    %190 = vector.broadcast %cst_56 : f32 to vector<8x64xf32>
    %191 = arith.addf %190, %189 : vector<8x64xf32>
    %192 = arith.divf %190, %191 : vector<8x64xf32>
    %193 = vector.extract_strided_slice %186 {offsets = [0, 64], sizes = [8, 64], strides = [1, 1]} : vector<8x256xf32> to vector<8x64xf32>
    %194 = arith.negf %193 : vector<8x64xf32>
    %195 = math.exp %194 : vector<8x64xf32>
    %cst_57 = arith.constant 1.000000e+00 : f32
    %196 = vector.broadcast %cst_57 : f32 to vector<8x64xf32>
    %197 = arith.addf %196, %195 : vector<8x64xf32>
    %198 = arith.divf %196, %197 : vector<8x64xf32>
    %199 = vector.extract_strided_slice %186 {offsets = [0, 128], sizes = [8, 64], strides = [1, 1]} : vector<8x256xf32> to vector<8x64xf32>
    %200 = math.tanh %199 : vector<8x64xf32>
    %201 = vector.extract_strided_slice %186 {offsets = [0, 192], sizes = [8, 64], strides = [1, 1]} : vector<8x256xf32> to vector<8x64xf32>
    %202 = arith.negf %201 : vector<8x64xf32>
    %203 = math.exp %202 : vector<8x64xf32>
    %cst_58 = arith.constant 1.000000e+00 : f32
    %204 = vector.broadcast %cst_58 : f32 to vector<8x64xf32>
    %205 = arith.addf %204, %203 : vector<8x64xf32>
    %206 = arith.divf %204, %205 : vector<8x64xf32>
    %207 = arith.mulf %198, %180 : vector<8x64xf32>
    %208 = arith.mulf %192, %200 : vector<8x64xf32>
    %209 = arith.addf %207, %208 : vector<8x64xf32>
    %210 = math.tanh %209 : vector<8x64xf32>
    %211 = arith.mulf %206, %210 : vector<8x64xf32>
    %c48_59 = arith.constant 48 : index
    %c0_60 = arith.constant 0 : index
    %212 = vector.load %arg11[%c48_59, %c0_60] : memref<64x64xf32, #tpu.memory_space<vmem>>, vector<8x64xf32>
    tpu.vector_store %arg11[%c48_59, %c0_60], %211 {strides = array<i32>} : memref<64x64xf32, #tpu.memory_space<vmem>>, vector<8x64xf32>,
    %c56 = arith.constant 56 : index
    %c0_61 = arith.constant 0 : index
    %213 = vector.load %arg9[%c56, %c0_61] : memref<64x256xf32, #tpu.memory_space<vmem>>, vector<8x256xf32>
    %cst_62 = arith.constant dense<0.000000e+00> : vector<8x256xf32>
    %214 = tpu.matmul %211, %7, %cst_62 {dimension_numbers = #tpu.dot_dimension_numbers<[1], [0], [0], [1], [0, 0, 1, 1], [], []>} : vector<8x64xf32>, vector<64x256xf32>, vector<8x256xf32> -> vector<8x256xf32>
    %215 = arith.addf %213, %214 : vector<8x256xf32>
    %216 = vector.extract_strided_slice %215 {offsets = [0, 0], sizes = [8, 64], strides = [1, 1]} : vector<8x256xf32> to vector<8x64xf32>
    %217 = arith.negf %216 : vector<8x64xf32>
    %218 = math.exp %217 : vector<8x64xf32>
    %cst_63 = arith.constant 1.000000e+00 : f32
    %219 = vector.broadcast %cst_63 : f32 to vector<8x64xf32>
    %220 = arith.addf %219, %218 : vector<8x64xf32>
    %221 = arith.divf %219, %220 : vector<8x64xf32>
    %222 = vector.extract_strided_slice %215 {offsets = [0, 64], sizes = [8, 64], strides = [1, 1]} : vector<8x256xf32> to vector<8x64xf32>
    %223 = arith.negf %222 : vector<8x64xf32>
    %224 = math.exp %223 : vector<8x64xf32>
    %cst_64 = arith.constant 1.000000e+00 : f32
    %225 = vector.broadcast %cst_64 : f32 to vector<8x64xf32>
    %226 = arith.addf %225, %224 : vector<8x64xf32>
    %227 = arith.divf %225, %226 : vector<8x64xf32>
    %228 = vector.extract_strided_slice %215 {offsets = [0, 128], sizes = [8, 64], strides = [1, 1]} : vector<8x256xf32> to vector<8x64xf32>
    %229 = math.tanh %228 : vector<8x64xf32>
    %230 = vector.extract_strided_slice %215 {offsets = [0, 192], sizes = [8, 64], strides = [1, 1]} : vector<8x256xf32> to vector<8x64xf32>
    %231 = arith.negf %230 : vector<8x64xf32>
    %232 = math.exp %231 : vector<8x64xf32>
    %cst_65 = arith.constant 1.000000e+00 : f32
    %233 = vector.broadcast %cst_65 : f32 to vector<8x64xf32>
    %234 = arith.addf %233, %232 : vector<8x64xf32>
    %235 = arith.divf %233, %234 : vector<8x64xf32>
    %236 = arith.mulf %227, %209 : vector<8x64xf32>
    %237 = arith.mulf %221, %229 : vector<8x64xf32>
    %238 = arith.addf %236, %237 : vector<8x64xf32>
    %239 = math.tanh %238 : vector<8x64xf32>
    %240 = arith.mulf %235, %239 : vector<8x64xf32>
    %c56_66 = arith.constant 56 : index
    %c0_67 = arith.constant 0 : index
    %241 = vector.load %arg11[%c56_66, %c0_67] : memref<64x64xf32, #tpu.memory_space<vmem>>, vector<8x64xf32>
    tpu.vector_store %arg11[%c56_66, %c0_67], %240 {strides = array<i32>} : memref<64x64xf32, #tpu.memory_space<vmem>>, vector<8x64xf32>,
    %c0_68 = arith.constant 0 : index
    %c0_69 = arith.constant 0 : index
    %242 = vector.load %arg11[%c0_68, %c0_69] : memref<64x64xf32, #tpu.memory_space<vmem>>, vector<64x64xf32>
    %c0_70 = arith.constant 0 : index
    %c0_71 = arith.constant 0 : index
    %243 = vector.load %arg5[%c0_70, %c0_71] : memref<64x256xf32, #tpu.memory_space<vmem>>, vector<64x256xf32>
    %cst_72 = arith.constant dense<0.000000e+00> : vector<64x256xf32>
    %244 = tpu.matmul %242, %243, %cst_72 {dimension_numbers = #tpu.dot_dimension_numbers<[1], [0], [0], [1], [0, 0, 1, 1], [], []>} : vector<64x64xf32>, vector<64x256xf32>, vector<64x256xf32> -> vector<64x256xf32>
    %c0_73 = arith.constant 0 : index
    %c0_74 = arith.constant 0 : index
    %245 = vector.load %arg7[%c0_73, %c0_74] : memref<1x256xf32, #tpu.memory_space<vmem>>, vector<1x256xf32>
    %246 = vector.broadcast %245 : vector<1x256xf32> to vector<64x256xf32>
    %247 = arith.addf %244, %246 : vector<64x256xf32>
    %c0_75 = arith.constant 0 : index
    %c0_76 = arith.constant 0 : index
    %248 = vector.load %arg10[%c0_75, %c0_76] : memref<64x256xf32, #tpu.memory_space<vmem>>, vector<64x256xf32>
    tpu.vector_store %arg10[%c0_75, %c0_76], %247 {strides = array<i32>} : memref<64x256xf32, #tpu.memory_space<vmem>>, vector<64x256xf32>,
    %c0_77 = arith.constant 0 : index
    %c0_78 = arith.constant 0 : index
    %249 = vector.load %arg6[%c0_77, %c0_78] : memref<64x256xf32, #tpu.memory_space<vmem>>, vector<64x256xf32>
    %cst_79 = arith.constant 0.000000e+00 : f32
    %250 = vector.broadcast %cst_79 : f32 to vector<8x64xf32>
    %cst_80 = arith.constant 0.000000e+00 : f32
    %251 = vector.broadcast %cst_80 : f32 to vector<8x64xf32>
    %c0_81 = arith.constant 0 : index
    %c0_82 = arith.constant 0 : index
    %252 = vector.load %arg10[%c0_81, %c0_82] : memref<64x256xf32, #tpu.memory_space<vmem>>, vector<8x256xf32>
    %cst_83 = arith.constant dense<0.000000e+00> : vector<8x256xf32>
    %253 = tpu.matmul %250, %249, %cst_83 {dimension_numbers = #tpu.dot_dimension_numbers<[1], [0], [0], [1], [0, 0, 1, 1], [], []>} : vector<8x64xf32>, vector<64x256xf32>, vector<8x256xf32> -> vector<8x256xf32>
    %254 = arith.addf %252, %253 : vector<8x256xf32>
    %255 = vector.extract_strided_slice %254 {offsets = [0, 0], sizes = [8, 64], strides = [1, 1]} : vector<8x256xf32> to vector<8x64xf32>
    %256 = arith.negf %255 : vector<8x64xf32>
    %257 = math.exp %256 : vector<8x64xf32>
    %cst_84 = arith.constant 1.000000e+00 : f32
    %258 = vector.broadcast %cst_84 : f32 to vector<8x64xf32>
    %259 = arith.addf %258, %257 : vector<8x64xf32>
    %260 = arith.divf %258, %259 : vector<8x64xf32>
    %261 = vector.extract_strided_slice %254 {offsets = [0, 64], sizes = [8, 64], strides = [1, 1]} : vector<8x256xf32> to vector<8x64xf32>
    %262 = arith.negf %261 : vector<8x64xf32>
    %263 = math.exp %262 : vector<8x64xf32>
    %cst_85 = arith.constant 1.000000e+00 : f32
    %264 = vector.broadcast %cst_85 : f32 to vector<8x64xf32>
    %265 = arith.addf %264, %263 : vector<8x64xf32>
    %266 = arith.divf %264, %265 : vector<8x64xf32>
    %267 = vector.extract_strided_slice %254 {offsets = [0, 128], sizes = [8, 64], strides = [1, 1]} : vector<8x256xf32> to vector<8x64xf32>
    %268 = math.tanh %267 : vector<8x64xf32>
    %269 = vector.extract_strided_slice %254 {offsets = [0, 192], sizes = [8, 64], strides = [1, 1]} : vector<8x256xf32> to vector<8x64xf32>
    %270 = arith.negf %269 : vector<8x64xf32>
    %271 = math.exp %270 : vector<8x64xf32>
    %cst_86 = arith.constant 1.000000e+00 : f32
    %272 = vector.broadcast %cst_86 : f32 to vector<8x64xf32>
    %273 = arith.addf %272, %271 : vector<8x64xf32>
    %274 = arith.divf %272, %273 : vector<8x64xf32>
    %275 = arith.mulf %266, %251 : vector<8x64xf32>
    %276 = arith.mulf %260, %268 : vector<8x64xf32>
    %277 = arith.addf %275, %276 : vector<8x64xf32>
    %278 = math.tanh %277 : vector<8x64xf32>
    %279 = arith.mulf %274, %278 : vector<8x64xf32>
    %c8_87 = arith.constant 8 : index
    %c0_88 = arith.constant 0 : index
    %280 = vector.load %arg10[%c8_87, %c0_88] : memref<64x256xf32, #tpu.memory_space<vmem>>, vector<8x256xf32>
    %cst_89 = arith.constant dense<0.000000e+00> : vector<8x256xf32>
    %281 = tpu.matmul %279, %249, %cst_89 {dimension_numbers = #tpu.dot_dimension_numbers<[1], [0], [0], [1], [0, 0, 1, 1], [], []>} : vector<8x64xf32>, vector<64x256xf32>, vector<8x256xf32> -> vector<8x256xf32>
    %282 = arith.addf %280, %281 : vector<8x256xf32>
    %283 = vector.extract_strided_slice %282 {offsets = [0, 0], sizes = [8, 64], strides = [1, 1]} : vector<8x256xf32> to vector<8x64xf32>
    %284 = arith.negf %283 : vector<8x64xf32>
    %285 = math.exp %284 : vector<8x64xf32>
    %cst_90 = arith.constant 1.000000e+00 : f32
    %286 = vector.broadcast %cst_90 : f32 to vector<8x64xf32>
    %287 = arith.addf %286, %285 : vector<8x64xf32>
    %288 = arith.divf %286, %287 : vector<8x64xf32>
    %289 = vector.extract_strided_slice %282 {offsets = [0, 64], sizes = [8, 64], strides = [1, 1]} : vector<8x256xf32> to vector<8x64xf32>
    %290 = arith.negf %289 : vector<8x64xf32>
    %291 = math.exp %290 : vector<8x64xf32>
    %cst_91 = arith.constant 1.000000e+00 : f32
    %292 = vector.broadcast %cst_91 : f32 to vector<8x64xf32>
    %293 = arith.addf %292, %291 : vector<8x64xf32>
    %294 = arith.divf %292, %293 : vector<8x64xf32>
    %295 = vector.extract_strided_slice %282 {offsets = [0, 128], sizes = [8, 64], strides = [1, 1]} : vector<8x256xf32> to vector<8x64xf32>
    %296 = math.tanh %295 : vector<8x64xf32>
    %297 = vector.extract_strided_slice %282 {offsets = [0, 192], sizes = [8, 64], strides = [1, 1]} : vector<8x256xf32> to vector<8x64xf32>
    %298 = arith.negf %297 : vector<8x64xf32>
    %299 = math.exp %298 : vector<8x64xf32>
    %cst_92 = arith.constant 1.000000e+00 : f32
    %300 = vector.broadcast %cst_92 : f32 to vector<8x64xf32>
    %301 = arith.addf %300, %299 : vector<8x64xf32>
    %302 = arith.divf %300, %301 : vector<8x64xf32>
    %303 = arith.mulf %294, %277 : vector<8x64xf32>
    %304 = arith.mulf %288, %296 : vector<8x64xf32>
    %305 = arith.addf %303, %304 : vector<8x64xf32>
    %306 = math.tanh %305 : vector<8x64xf32>
    %307 = arith.mulf %302, %306 : vector<8x64xf32>
    %c16_93 = arith.constant 16 : index
    %c0_94 = arith.constant 0 : index
    %308 = vector.load %arg10[%c16_93, %c0_94] : memref<64x256xf32, #tpu.memory_space<vmem>>, vector<8x256xf32>
    %cst_95 = arith.constant dense<0.000000e+00> : vector<8x256xf32>
    %309 = tpu.matmul %307, %249, %cst_95 {dimension_numbers = #tpu.dot_dimension_numbers<[1], [0], [0], [1], [0, 0, 1, 1], [], []>} : vector<8x64xf32>, vector<64x256xf32>, vector<8x256xf32> -> vector<8x256xf32>
    %310 = arith.addf %308, %309 : vector<8x256xf32>
    %311 = vector.extract_strided_slice %310 {offsets = [0, 0], sizes = [8, 64], strides = [1, 1]} : vector<8x256xf32> to vector<8x64xf32>
    %312 = arith.negf %311 : vector<8x64xf32>
    %313 = math.exp %312 : vector<8x64xf32>
    %cst_96 = arith.constant 1.000000e+00 : f32
    %314 = vector.broadcast %cst_96 : f32 to vector<8x64xf32>
    %315 = arith.addf %314, %313 : vector<8x64xf32>
    %316 = arith.divf %314, %315 : vector<8x64xf32>
    %317 = vector.extract_strided_slice %310 {offsets = [0, 64], sizes = [8, 64], strides = [1, 1]} : vector<8x256xf32> to vector<8x64xf32>
    %318 = arith.negf %317 : vector<8x64xf32>
    %319 = math.exp %318 : vector<8x64xf32>
    %cst_97 = arith.constant 1.000000e+00 : f32
    %320 = vector.broadcast %cst_97 : f32 to vector<8x64xf32>
    %321 = arith.addf %320, %319 : vector<8x64xf32>
    %322 = arith.divf %320, %321 : vector<8x64xf32>
    %323 = vector.extract_strided_slice %310 {offsets = [0, 128], sizes = [8, 64], strides = [1, 1]} : vector<8x256xf32> to vector<8x64xf32>
    %324 = math.tanh %323 : vector<8x64xf32>
    %325 = vector.extract_strided_slice %310 {offsets = [0, 192], sizes = [8, 64], strides = [1, 1]} : vector<8x256xf32> to vector<8x64xf32>
    %326 = arith.negf %325 : vector<8x64xf32>
    %327 = math.exp %326 : vector<8x64xf32>
    %cst_98 = arith.constant 1.000000e+00 : f32
    %328 = vector.broadcast %cst_98 : f32 to vector<8x64xf32>
    %329 = arith.addf %328, %327 : vector<8x64xf32>
    %330 = arith.divf %328, %329 : vector<8x64xf32>
    %331 = arith.mulf %322, %305 : vector<8x64xf32>
    %332 = arith.mulf %316, %324 : vector<8x64xf32>
    %333 = arith.addf %331, %332 : vector<8x64xf32>
    %334 = math.tanh %333 : vector<8x64xf32>
    %335 = arith.mulf %330, %334 : vector<8x64xf32>
    %c24_99 = arith.constant 24 : index
    %c0_100 = arith.constant 0 : index
    %336 = vector.load %arg10[%c24_99, %c0_100] : memref<64x256xf32, #tpu.memory_space<vmem>>, vector<8x256xf32>
    %cst_101 = arith.constant dense<0.000000e+00> : vector<8x256xf32>
    %337 = tpu.matmul %335, %249, %cst_101 {dimension_numbers = #tpu.dot_dimension_numbers<[1], [0], [0], [1], [0, 0, 1, 1], [], []>} : vector<8x64xf32>, vector<64x256xf32>, vector<8x256xf32> -> vector<8x256xf32>
    %338 = arith.addf %336, %337 : vector<8x256xf32>
    %339 = vector.extract_strided_slice %338 {offsets = [0, 0], sizes = [8, 64], strides = [1, 1]} : vector<8x256xf32> to vector<8x64xf32>
    %340 = arith.negf %339 : vector<8x64xf32>
    %341 = math.exp %340 : vector<8x64xf32>
    %cst_102 = arith.constant 1.000000e+00 : f32
    %342 = vector.broadcast %cst_102 : f32 to vector<8x64xf32>
    %343 = arith.addf %342, %341 : vector<8x64xf32>
    %344 = arith.divf %342, %343 : vector<8x64xf32>
    %345 = vector.extract_strided_slice %338 {offsets = [0, 64], sizes = [8, 64], strides = [1, 1]} : vector<8x256xf32> to vector<8x64xf32>
    %346 = arith.negf %345 : vector<8x64xf32>
    %347 = math.exp %346 : vector<8x64xf32>
    %cst_103 = arith.constant 1.000000e+00 : f32
    %348 = vector.broadcast %cst_103 : f32 to vector<8x64xf32>
    %349 = arith.addf %348, %347 : vector<8x64xf32>
    %350 = arith.divf %348, %349 : vector<8x64xf32>
    %351 = vector.extract_strided_slice %338 {offsets = [0, 128], sizes = [8, 64], strides = [1, 1]} : vector<8x256xf32> to vector<8x64xf32>
    %352 = math.tanh %351 : vector<8x64xf32>
    %353 = vector.extract_strided_slice %338 {offsets = [0, 192], sizes = [8, 64], strides = [1, 1]} : vector<8x256xf32> to vector<8x64xf32>
    %354 = arith.negf %353 : vector<8x64xf32>
    %355 = math.exp %354 : vector<8x64xf32>
    %cst_104 = arith.constant 1.000000e+00 : f32
    %356 = vector.broadcast %cst_104 : f32 to vector<8x64xf32>
    %357 = arith.addf %356, %355 : vector<8x64xf32>
    %358 = arith.divf %356, %357 : vector<8x64xf32>
    %359 = arith.mulf %350, %333 : vector<8x64xf32>
    %360 = arith.mulf %344, %352 : vector<8x64xf32>
    %361 = arith.addf %359, %360 : vector<8x64xf32>
    %362 = math.tanh %361 : vector<8x64xf32>
    %363 = arith.mulf %358, %362 : vector<8x64xf32>
    %c32_105 = arith.constant 32 : index
    %c0_106 = arith.constant 0 : index
    %364 = vector.load %arg10[%c32_105, %c0_106] : memref<64x256xf32, #tpu.memory_space<vmem>>, vector<8x256xf32>
    %cst_107 = arith.constant dense<0.000000e+00> : vector<8x256xf32>
    %365 = tpu.matmul %363, %249, %cst_107 {dimension_numbers = #tpu.dot_dimension_numbers<[1], [0], [0], [1], [0, 0, 1, 1], [], []>} : vector<8x64xf32>, vector<64x256xf32>, vector<8x256xf32> -> vector<8x256xf32>
    %366 = arith.addf %364, %365 : vector<8x256xf32>
    %367 = vector.extract_strided_slice %366 {offsets = [0, 0], sizes = [8, 64], strides = [1, 1]} : vector<8x256xf32> to vector<8x64xf32>
    %368 = arith.negf %367 : vector<8x64xf32>
    %369 = math.exp %368 : vector<8x64xf32>
    %cst_108 = arith.constant 1.000000e+00 : f32
    %370 = vector.broadcast %cst_108 : f32 to vector<8x64xf32>
    %371 = arith.addf %370, %369 : vector<8x64xf32>
    %372 = arith.divf %370, %371 : vector<8x64xf32>
    %373 = vector.extract_strided_slice %366 {offsets = [0, 64], sizes = [8, 64], strides = [1, 1]} : vector<8x256xf32> to vector<8x64xf32>
    %374 = arith.negf %373 : vector<8x64xf32>
    %375 = math.exp %374 : vector<8x64xf32>
    %cst_109 = arith.constant 1.000000e+00 : f32
    %376 = vector.broadcast %cst_109 : f32 to vector<8x64xf32>
    %377 = arith.addf %376, %375 : vector<8x64xf32>
    %378 = arith.divf %376, %377 : vector<8x64xf32>
    %379 = vector.extract_strided_slice %366 {offsets = [0, 128], sizes = [8, 64], strides = [1, 1]} : vector<8x256xf32> to vector<8x64xf32>
    %380 = math.tanh %379 : vector<8x64xf32>
    %381 = vector.extract_strided_slice %366 {offsets = [0, 192], sizes = [8, 64], strides = [1, 1]} : vector<8x256xf32> to vector<8x64xf32>
    %382 = arith.negf %381 : vector<8x64xf32>
    %383 = math.exp %382 : vector<8x64xf32>
    %cst_110 = arith.constant 1.000000e+00 : f32
    %384 = vector.broadcast %cst_110 : f32 to vector<8x64xf32>
    %385 = arith.addf %384, %383 : vector<8x64xf32>
    %386 = arith.divf %384, %385 : vector<8x64xf32>
    %387 = arith.mulf %378, %361 : vector<8x64xf32>
    %388 = arith.mulf %372, %380 : vector<8x64xf32>
    %389 = arith.addf %387, %388 : vector<8x64xf32>
    %390 = math.tanh %389 : vector<8x64xf32>
    %391 = arith.mulf %386, %390 : vector<8x64xf32>
    %c40_111 = arith.constant 40 : index
    %c0_112 = arith.constant 0 : index
    %392 = vector.load %arg10[%c40_111, %c0_112] : memref<64x256xf32, #tpu.memory_space<vmem>>, vector<8x256xf32>
    %cst_113 = arith.constant dense<0.000000e+00> : vector<8x256xf32>
    %393 = tpu.matmul %391, %249, %cst_113 {dimension_numbers = #tpu.dot_dimension_numbers<[1], [0], [0], [1], [0, 0, 1, 1], [], []>} : vector<8x64xf32>, vector<64x256xf32>, vector<8x256xf32> -> vector<8x256xf32>
    %394 = arith.addf %392, %393 : vector<8x256xf32>
    %395 = vector.extract_strided_slice %394 {offsets = [0, 0], sizes = [8, 64], strides = [1, 1]} : vector<8x256xf32> to vector<8x64xf32>
    %396 = arith.negf %395 : vector<8x64xf32>
    %397 = math.exp %396 : vector<8x64xf32>
    %cst_114 = arith.constant 1.000000e+00 : f32
    %398 = vector.broadcast %cst_114 : f32 to vector<8x64xf32>
    %399 = arith.addf %398, %397 : vector<8x64xf32>
    %400 = arith.divf %398, %399 : vector<8x64xf32>
    %401 = vector.extract_strided_slice %394 {offsets = [0, 64], sizes = [8, 64], strides = [1, 1]} : vector<8x256xf32> to vector<8x64xf32>
    %402 = arith.negf %401 : vector<8x64xf32>
    %403 = math.exp %402 : vector<8x64xf32>
    %cst_115 = arith.constant 1.000000e+00 : f32
    %404 = vector.broadcast %cst_115 : f32 to vector<8x64xf32>
    %405 = arith.addf %404, %403 : vector<8x64xf32>
    %406 = arith.divf %404, %405 : vector<8x64xf32>
    %407 = vector.extract_strided_slice %394 {offsets = [0, 128], sizes = [8, 64], strides = [1, 1]} : vector<8x256xf32> to vector<8x64xf32>
    %408 = math.tanh %407 : vector<8x64xf32>
    %409 = vector.extract_strided_slice %394 {offsets = [0, 192], sizes = [8, 64], strides = [1, 1]} : vector<8x256xf32> to vector<8x64xf32>
    %410 = arith.negf %409 : vector<8x64xf32>
    %411 = math.exp %410 : vector<8x64xf32>
    %cst_116 = arith.constant 1.000000e+00 : f32
    %412 = vector.broadcast %cst_116 : f32 to vector<8x64xf32>
    %413 = arith.addf %412, %411 : vector<8x64xf32>
    %414 = arith.divf %412, %413 : vector<8x64xf32>
    %415 = arith.mulf %406, %389 : vector<8x64xf32>
    %416 = arith.mulf %400, %408 : vector<8x64xf32>
    %417 = arith.addf %415, %416 : vector<8x64xf32>
    %418 = math.tanh %417 : vector<8x64xf32>
    %419 = arith.mulf %414, %418 : vector<8x64xf32>
    %c48_117 = arith.constant 48 : index
    %c0_118 = arith.constant 0 : index
    %420 = vector.load %arg10[%c48_117, %c0_118] : memref<64x256xf32, #tpu.memory_space<vmem>>, vector<8x256xf32>
    %cst_119 = arith.constant dense<0.000000e+00> : vector<8x256xf32>
    %421 = tpu.matmul %419, %249, %cst_119 {dimension_numbers = #tpu.dot_dimension_numbers<[1], [0], [0], [1], [0, 0, 1, 1], [], []>} : vector<8x64xf32>, vector<64x256xf32>, vector<8x256xf32> -> vector<8x256xf32>
    %422 = arith.addf %420, %421 : vector<8x256xf32>
    %423 = vector.extract_strided_slice %422 {offsets = [0, 0], sizes = [8, 64], strides = [1, 1]} : vector<8x256xf32> to vector<8x64xf32>
    %424 = arith.negf %423 : vector<8x64xf32>
    %425 = math.exp %424 : vector<8x64xf32>
    %cst_120 = arith.constant 1.000000e+00 : f32
    %426 = vector.broadcast %cst_120 : f32 to vector<8x64xf32>
    %427 = arith.addf %426, %425 : vector<8x64xf32>
    %428 = arith.divf %426, %427 : vector<8x64xf32>
    %429 = vector.extract_strided_slice %422 {offsets = [0, 64], sizes = [8, 64], strides = [1, 1]} : vector<8x256xf32> to vector<8x64xf32>
    %430 = arith.negf %429 : vector<8x64xf32>
    %431 = math.exp %430 : vector<8x64xf32>
    %cst_121 = arith.constant 1.000000e+00 : f32
    %432 = vector.broadcast %cst_121 : f32 to vector<8x64xf32>
    %433 = arith.addf %432, %431 : vector<8x64xf32>
    %434 = arith.divf %432, %433 : vector<8x64xf32>
    %435 = vector.extract_strided_slice %422 {offsets = [0, 128], sizes = [8, 64], strides = [1, 1]} : vector<8x256xf32> to vector<8x64xf32>
    %436 = math.tanh %435 : vector<8x64xf32>
    %437 = vector.extract_strided_slice %422 {offsets = [0, 192], sizes = [8, 64], strides = [1, 1]} : vector<8x256xf32> to vector<8x64xf32>
    %438 = arith.negf %437 : vector<8x64xf32>
    %439 = math.exp %438 : vector<8x64xf32>
    %cst_122 = arith.constant 1.000000e+00 : f32
    %440 = vector.broadcast %cst_122 : f32 to vector<8x64xf32>
    %441 = arith.addf %440, %439 : vector<8x64xf32>
    %442 = arith.divf %440, %441 : vector<8x64xf32>
    %443 = arith.mulf %434, %417 : vector<8x64xf32>
    %444 = arith.mulf %428, %436 : vector<8x64xf32>
    %445 = arith.addf %443, %444 : vector<8x64xf32>
    %446 = math.tanh %445 : vector<8x64xf32>
    %447 = arith.mulf %442, %446 : vector<8x64xf32>
    %c56_123 = arith.constant 56 : index
    %c0_124 = arith.constant 0 : index
    %448 = vector.load %arg10[%c56_123, %c0_124] : memref<64x256xf32, #tpu.memory_space<vmem>>, vector<8x256xf32>
    %cst_125 = arith.constant dense<0.000000e+00> : vector<8x256xf32>
    %449 = tpu.matmul %447, %249, %cst_125 {dimension_numbers = #tpu.dot_dimension_numbers<[1], [0], [0], [1], [0, 0, 1, 1], [], []>} : vector<8x64xf32>, vector<64x256xf32>, vector<8x256xf32> -> vector<8x256xf32>
    %450 = arith.addf %448, %449 : vector<8x256xf32>
    %451 = vector.extract_strided_slice %450 {offsets = [0, 0], sizes = [8, 64], strides = [1, 1]} : vector<8x256xf32> to vector<8x64xf32>
    %452 = arith.negf %451 : vector<8x64xf32>
    %453 = math.exp %452 : vector<8x64xf32>
    %cst_126 = arith.constant 1.000000e+00 : f32
    %454 = vector.broadcast %cst_126 : f32 to vector<8x64xf32>
    %455 = arith.addf %454, %453 : vector<8x64xf32>
    %456 = arith.divf %454, %455 : vector<8x64xf32>
    %457 = vector.extract_strided_slice %450 {offsets = [0, 64], sizes = [8, 64], strides = [1, 1]} : vector<8x256xf32> to vector<8x64xf32>
    %458 = arith.negf %457 : vector<8x64xf32>
    %459 = math.exp %458 : vector<8x64xf32>
    %cst_127 = arith.constant 1.000000e+00 : f32
    %460 = vector.broadcast %cst_127 : f32 to vector<8x64xf32>
    %461 = arith.addf %460, %459 : vector<8x64xf32>
    %462 = arith.divf %460, %461 : vector<8x64xf32>
    %463 = vector.extract_strided_slice %450 {offsets = [0, 128], sizes = [8, 64], strides = [1, 1]} : vector<8x256xf32> to vector<8x64xf32>
    %464 = math.tanh %463 : vector<8x64xf32>
    %465 = vector.extract_strided_slice %450 {offsets = [0, 192], sizes = [8, 64], strides = [1, 1]} : vector<8x256xf32> to vector<8x64xf32>
    %466 = arith.negf %465 : vector<8x64xf32>
    %467 = math.exp %466 : vector<8x64xf32>
    %cst_128 = arith.constant 1.000000e+00 : f32
    %468 = vector.broadcast %cst_128 : f32 to vector<8x64xf32>
    %469 = arith.addf %468, %467 : vector<8x64xf32>
    %470 = arith.divf %468, %469 : vector<8x64xf32>
    %471 = arith.mulf %462, %445 : vector<8x64xf32>
    %472 = arith.mulf %456, %464 : vector<8x64xf32>
    %473 = arith.addf %471, %472 : vector<8x64xf32>
    %474 = math.tanh %473 : vector<8x64xf32>
    %475 = arith.mulf %470, %474 : vector<8x64xf32>
    %c0_129 = arith.constant 0 : index
    %c0_130 = arith.constant 0 : index
    %476 = vector.load %arg8[%c0_129, %c0_130] : memref<8x64xf32, #tpu.memory_space<vmem>>, vector<8x64xf32>
    tpu.vector_store %arg8[%c0_129, %c0_130], %475 {strides = array<i32>} : memref<8x64xf32, #tpu.memory_space<vmem>>, vector<8x64xf32>,
    return
  }
  func.func @transform_0(%arg0: i32) -> (i32, i32) {
    %c0_i32 = arith.constant 0 : i32
    %c0_i32_0 = arith.constant 0 : i32
    %c0_i32_1 = arith.constant 0 : i32
    return %c0_i32, %c0_i32_0 : i32, i32
  }
  func.func @transform_1(%arg0: i32) -> (i32, i32) {
    %c0_i32 = arith.constant 0 : i32
    %c0_i32_0 = arith.constant 0 : i32
    %c0_i32_1 = arith.constant 0 : i32
    return %c0_i32, %c0_i32_0 : i32, i32
  }
  func.func @transform_2(%arg0: i32) -> (i32, i32) {
    %c0_i32 = arith.constant 0 : i32
    %c0_i32_0 = arith.constant 0 : i32
    %c0_i32_1 = arith.constant 0 : i32
    return %c0_i32, %c0_i32_0 : i32, i32
  }
  func.func @transform_3(%arg0: i32) -> (i32, i32) {
    %c0_i32 = arith.constant 0 : i32
    %c0_i32_0 = arith.constant 0 : i32
    %c0_i32_1 = arith.constant 0 : i32
    return %c0_i32, %c0_i32_0 : i32, i32
  }
  func.func @transform_4(%arg0: i32) -> (i32, i32) {
    %c0_i32 = arith.constant 0 : i32
    %c0_i32_0 = arith.constant 0 : i32
    %c0_i32_1 = arith.constant 0 : i32
    return %c0_i32, %c0_i32_0 : i32, i32
  }
  func.func @transform_5(%arg0: i32) -> (i32, i32) {
    %c0_i32 = arith.constant 0 : i32
    %c0_i32_0 = arith.constant 0 : i32
    %c0_i32_1 = arith.constant 0 : i32
    return %c0_i32, %c0_i32_0 : i32, i32
  }
  func.func @transform_6(%arg0: i32) -> (i32, i32) {
    %c0_i32 = arith.constant 0 : i32
    %c0_i32_0 = arith.constant 0 : i32
    %c0_i32_1 = arith.constant 0 : i32
    return %c0_i32, %c0_i32_0 : i32, i32
  }
  func.func @transform_7(%arg0: i32) -> (i32, i32) {
    %c0_i32 = arith.constant 0 : i32
    %c0_i32_0 = arith.constant 0 : i32
    %c0_i32_1 = arith.constant 0 : i32
    return %c0_i32, %c0_i32_0 : i32, i32
  }
}

</mosaic_0001>

<bundles_post_ra>
// kernel: lstm_forward.1
= control target key start
LH: loop header
LB: loop body
LE: loop exit
PB: predicated region body
PF: predicated region fallthrough
CT: control target
= control target key end

     0   :  { %12 = vsyncpa [#allocation6], 0  ;;  %s3106_s0 = inlined_call_operand.vmem [shape: f32[64,7], index: 0, kind: input, shape index: {}]   ;;  %s3107_s1 = inlined_call_operand.vmem [shape: f32[7,256], index: 1, kind: input, shape index: {}]   ;;  %s3108_s2 = inlined_call_operand.vmem [shape: f32[64,256], index: 2, kind: input, shape index: {}]   ;;  %s3109_s3 = inlined_call_operand.vmem [shape: f32[1,256], index: 3, kind: input, shape index: {}]   ;;  %s3110_s4 = inlined_call_operand.hbm [shape: f32[64,256], index: 4, kind: input, shape index: {}]   ;;  %s3111_s5 = inlined_call_operand.hbm [shape: f32[64,256], index: 5, kind: input, shape index: {}]   ;;  %s3112_s6 = inlined_call_operand.vmem [shape: f32[1,256], index: 6, kind: input, shape index: {}]   ;;  %s3113_s7 = inlined_call_operand.vmem [shape: f32[8,64], index: 7, kind: output, shape index: {}]  }
   0x1   :  { %13 = vsyncpa [#allocation8], 0  ;;  %s2420_s24 = smov [#allocation5]  }
   0x2   :  { %s27_s25 = sshll.u32 %s2420_s24, 4  ;;  %s28_s25 = int_to_ptr.vmem [resolvable:$true] %s27_s25 }
   0x3   :  { %s2384_s26 = scalar_lea.vmem %s28_s25, 2048  ;;  %p2389_p1 = scmp.lt.s32.totalorder %s28_s25, %s28_s25 }
   0x4   :  { %p2385_p0 = scmp.ne.s32.totalorder %s28_s25, %s2384_s26  ;;  %p2390_p2 = scmp.lt.s32.totalorder %s2384_s26, %s2384_s26 }
   0x6   :  { %p2391_p3 = por %p2390_p2, %p2389_p1 }
   0x8   :  { %p2392_p4 = pnand %p2391_p3, %p2385_p0 }
   0xa   :  { %2395 = shalt.err (!%p2392_p4)
}
   0xb   :  { %s2421_s27 = smov 256   ;;  %s2422_s28 = smov 16  }
   0xc   :  { %33 = dma.hbm_to_vmem [thread:$0]  %s3110_s4, 2048, %s28_s25, [#allocation6], %s2421_s27, %s2421_s27, %s2422_s28  }
   0xd   :  { %s2423_s8 = smov [#allocation7]  }
   0xe   :  { %s39_s9 = sshll.u32 %s2423_s8, 4  ;;  %s40_s9 = int_to_ptr.vmem [resolvable:$true] %s39_s9 }
   0xf   :  { %s2404_s10 = scalar_lea.vmem %s40_s9, 2048  ;;  %p2409_p6 = scmp.lt.s32.totalorder %s40_s9, %s40_s9 }
  0x10   :  { %p2405_p5 = scmp.ne.s32.totalorder %s40_s9, %s2404_s10  ;;  %p2410_p7 = scmp.lt.s32.totalorder %s2404_s10, %s2404_s10 }
  0x12   :  { %p2411_p8 = por %p2410_p7, %p2409_p6 }
  0x14   :  { %p2412_p9 = pnand %p2411_p8, %p2405_p5 }
  0x16   :  { %2415 = shalt.err (!%p2412_p9)
}
  0x17   :  { %45 = dma.hbm_to_vmem [thread:$0]  %s3111_s5, 2048, %s40_s9, [#allocation8], %s2421_s27, %s2421_s27, %s2422_s28  }
  0x18   :  { %2416 = dma.done.wait [#allocation6], 2048  }
  0x19   :  { %2417 = vsyncadd [#allocation6], 4294965248 }
  0x1a   :  { %2418 = dma.done.wait [#allocation8], 2048  }
  0x1b   :  { %2419 = vsyncadd [#allocation8], 4294965248  ;;  %v2424_v0 = vmov 0.0   ;;  %v2477_v1 = vld [vmem:[%s3108_s2 + $0x78] sm:$0xff]  ;;  %v2482_v2 = vld [vmem:[%s3108_s2 + $0x70] sm:$0xff]  ;;  %vm101_vm0 = vcmask 1046528   ;;  %v66_v20 = vlaneseq }
  0x1c   :  { %172 = vmatprep.mubr.f32.mxu0 %v2424_v0  ;;  %323 = vmatprep.mubr.f32.mxu1 %v2424_v0  ;;  %v2487_v3 = vld [vmem:[%s3108_s2 + $0x68] sm:$0xff]  ;;  %v2493_v4 = vld [vmem:[%s3108_s2 + $0x60] sm:$0xff]  ;;  %v2499_v5 = vld [vmem:[%s3108_s2 + $0x58] sm:$0xff]  ;;  %vm76_vm1 = vcmask 56320   ;;  %vm255_vm2 = vcmask 523264  }
  0x1d   :  { %275 = vmatprep.subr.mxu1 %v2477_v1  ;;  %v2505_v6 = vld [vmem:[%s3108_s2 + $0x50] sm:$0xff]  ;;  %v63_v7 = vld [vmem:[%s3107_s1 + $0x8] sm:$0x7f]  ;;  %v62_v9 = vld [vmem:[%s3107_s1] sm:$0x7f]  ;;  %v2617_v21 = vshrl.u32 %v66_v20, 7 }
  0x1e   :  { %276 = vmatpush1.msra.mxu1 %v2482_v2  ;;  %v2514_v8 = vld [vmem:[%s3108_s2 + $0x48] sm:$0xff]  ;;  %2114 = vmatprep.subr.msk.mxu0 %vm101_vm0, %v63_v7  ;;  %v54_v10 = vld [vmem:[%s3106_s0] sm:$0xff]  ;;  %v2532_v12 = vld [vmem:[%s3108_s2 + $0x38] sm:$0xff] }
  0x1f   :  { %277 = vmatprep.subr.mxu1 %v2487_v3  ;;  %v2526_v11 = vld [vmem:[%s3108_s2 + $0x40] sm:$0xff]  ;;  %2115 = vmatpush1.msk.msra.mxu0 %vm101_vm0, %v62_v9  ;;  %v2539_v13 = vld [vmem:[%s3108_s2 + $0x30] sm:$0xff]  ;;  %v2546_v14 = vld [vmem:[%s3108_s2 + $0x28] sm:$0xff]  ;;  %v68_v22 = vsub.s32 0, %v2617_v21  ;;  %v72_v30 = vsub.s32 1, %v2617_v21 }
  0x20   :  { %278 = vmatpush1.msra.mxu1 %v2493_v4  ;;  %2116 = vmatmul.mubr.msk.f32.vlgmr.msra.gmra.mxu0 %vm76_vm1, %v54_v10  ;;  %v2553_v15 = vld [vmem:[%s3108_s2 + $0x20] sm:$0xff]  ;;  %v2560_v16 = vld [vmem:[%s3108_s2 + $0x18] sm:$0xff]  ;;  %v2567_v17 = vld [vmem:[%s3108_s2 + $0x10] sm:$0xff] }
  0x21   :  { %279 = vmatprep.subr.mxu1 %v2499_v5  ;;  %178 = vmatprep.mubr.f32.mxu0 %v2424_v0  ;;  %v2574_v18 = vld [vmem:[%s3108_s2 + $0x8] sm:$0xff]  ;;  %v2581_v19 = vld [vmem:[%s3108_s2] sm:$0xff]  ;;  %v56_v10 = vld [vmem:[%s3106_s0 + $0x10] sm:$0xff] }
  0x22   :  { %280 = vmatpush1.msra.mxu1 %v2505_v6  ;;  %483 = vmatprep.subr.mxu0 %v2477_v1  ;;  %v64_v23 = vld [vmem:[%s3109_s3] sm:$0x3]  ;;  %s2425_s3 = smov 64   ;;  %v55_v41 = vld [vmem:[%s3106_s0 + $0x8] sm:$0xff]  ;;  %v57_v20 = vld [vmem:[%s3106_s0 + $0x18] sm:$0xff] }
  0x23   :  { %281 = vmatprep.subr.mxu1 %v2514_v8  ;;  %484 = vmatpush1.msra.mxu0 %v2482_v2  ;;  %v2625_v24 = vrot.slane %v64_v23, %v68_v22  ;;  %v2631_v31 = vrot.slane %v64_v23, %v72_v30  ;;  %v58_v23 = vld [vmem:[%s3106_s0 + $0x20] sm:$0xff] }
  0x24   :  { %282 = vmatpush1.msra.mxu1 %v2526_v11  ;;  %485 = vmatprep.subr.mxu0 %v2487_v3 }
  0x25   :  { %283 = vmatprep.subr.mxu1 %v2532_v12  ;;  %486 = vmatpush1.msra.mxu0 %v2493_v4 }
  0x26   :  { %284 = vmatpush1.msra.mxu1 %v2539_v13  ;;  %487 = vmatprep.subr.mxu0 %v2499_v5 }
  0x27   :  { %285 = vmatprep.subr.mxu1 %v2546_v14  ;;  %488 = vmatpush1.msra.mxu0 %v2505_v6 }
  0x28   :  { %286 = vmatpush1.msra.mxu1 %v2553_v15  ;;  %489 = vmatprep.subr.mxu0 %v2514_v8 }
  0x29   :  { %287 = vmatprep.subr.mxu1 %v2560_v16  ;;  %490 = vmatpush1.msra.mxu0 %v2526_v11 }
  0x2a   :  { %288 = vmatpush1.msra.mxu1 %v2567_v17  ;;  %491 = vmatprep.subr.mxu0 %v2532_v12 }
  0x2b   :  { %289 = vmatprep.subr.mxu1 %v2574_v18  ;;  %492 = vmatpush1.msra.mxu0 %v2539_v13 }
  0x2c   :  { %290 = vmatpush1.msra.mxu1 %v2581_v19  ;;  %493 = vmatprep.subr.mxu0 %v2546_v14 }
  0x2d   :  { %324 = vmatmul.mubr.f32.vlgmr.msra.gmra.mxu1 %v2424_v0  ;;  %379 = vmatprep.subr.mxu1 %v2477_v1 }
  0x2e   :  { %380 = vmatpush1.msra.mxu1 %v2482_v2  ;;  %427 = vmatprep.mubr.f32.mxu1 %v2424_v0 }
  0x2f   :  { %381 = vmatprep.subr.mxu1 %v2487_v3  ;;  %494 = vmatpush1.msra.mxu0 %v2553_v15 }
  0x30   :  { %382 = vmatpush1.msra.mxu1 %v2493_v4  ;;  %495 = vmatprep.subr.mxu0 %v2560_v16 }
  0x31   :  { %383 = vmatprep.subr.mxu1 %v2499_v5  ;;  %496 = vmatpush1.msra.mxu0 %v2567_v17 }
  0x32   :  { %384 = vmatpush1.msra.mxu1 %v2505_v6  ;;  %497 = vmatprep.subr.mxu0 %v2574_v18 }
  0x33   :  { %385 = vmatprep.subr.mxu1 %v2514_v8  ;;  %498 = vmatpush1.msra.mxu0 %v2581_v19 }
  0x34   :  { %386 = vmatpush1.msra.mxu1 %v2526_v11  ;;  %691 = vmatprep.subr.mxu0 %v2477_v1 }
  0x35   :  { %387 = vmatprep.subr.mxu1 %v2532_v12  ;;  %2117 = vmatmul.mubr.msk.f32.gmra.mxu0 %vm76_vm1, %v55_v41 }
  0x36   :  { %388 = vmatpush1.msra.mxu1 %v2539_v13  ;;  %184 = vmatprep.mubr.f32.mxu0 %v2424_v0 }
  0x37   :  { %389 = vmatprep.subr.mxu1 %v2546_v14 }
  0x38   :  { %390 = vmatpush1.msra.mxu1 %v2553_v15 }
  0x39   :  { %391 = vmatprep.subr.mxu1 %v2560_v16  ;;  %2118 = vmatmul.mubr.msk.f32.gmra.mxu0 %vm76_vm1, %v56_v10 }
  0x3a   :  { %392 = vmatpush1.msra.mxu1 %v2567_v17  ;;  %190 = vmatprep.mubr.f32.mxu0 %v2424_v0 }
  0x3b   :  { %393 = vmatprep.subr.mxu1 %v2574_v18 }
  0x3c   :  { %394 = vmatpush1.msra.mxu1 %v2581_v19 }
  0x3d   :  { %587 = vmatprep.subr.mxu1 %v2477_v1  ;;  %2119 = vmatmul.mubr.msk.f32.gmra.mxu0 %vm76_vm1, %v57_v20 }
  0x3e   :  { %196 = vmatprep.mubr.f32.mxu0 %v2424_v0 }
  0x41   :  { %2120 = vmatmul.mubr.msk.f32.gmra.mxu0 %vm76_vm1, %v58_v23 }
  0x42   :  { %202 = vmatprep.mubr.f32.mxu0 %v2424_v0 }
  0xe0   :  { %v174_v25 = vpop.f32.mrf.mxu0 }
  0xe1   :  { %v175_v26 = vadd.f32 %v174_v25, %v2625_v24  ;;  %v59_v25 = vld [vmem:[%s3106_s0 + $0x28] sm:$0xff] }
  0xe2   :  { %v176_v32 = vpop.f32.mrf.mxu0  ;;  %2121 = vmatmul.mubr.msk.f32.gmra.mxu0 %vm76_vm1, %v59_v25 }
  0xe3   :  { %v177_v34 = vadd.f32 %v176_v32, %v2631_v31  ;;  %208 = vmatprep.mubr.f32.mxu0 %v2424_v0 }
  0xed   :  { %v325_v27 = vpop.f32.mrf.mxu1 }
  0xee   :  { %v330_v28 = vadd.f32 %v325_v27, %v175_v26  ;;  %v60_v26 = vld [vmem:[%s3106_s0 + $0x30] sm:$0xff]  ;;  %v61_v27 = vld [vmem:[%s3106_s0 + $0x38] sm:$0xff] }
  0xef   :  { %v327_v33 = vpop.f32.mrf.mxu1  ;;  %2122 = vmatmul.mubr.msk.f32.gmra.mxu0 %vm76_vm1, %v60_v26 }
  0xf0   :  { %v2124_v29 = vmul.f32 -1.442695, %v330_v28  ;;  %v331_v35 = vadd.f32 %v327_v33, %v177_v34  ;;  %214 = vmatprep.mubr.f32.mxu0 %v2424_v0 }
  0xf2   :  { %2184 = vpow2.f32 %v2124_v29  ;;  %v2125_v42 = vmul.f32 -1.442695, %v331_v35 }
  0xf3   :  { %2186 = vtanh.f32 %v331_v35  ;;  %2123 = vmatmul.mubr.msk.f32.gmra.mxu0 %vm76_vm1, %v61_v27 }
  0xf4   :  { %531 = vmatprep.mubr.f32.mxu0 %v2424_v0 }
  0xf5   :  { %v180_v52 = vpop.f32.mrf.mxu0 }
  0xf6   :  { %v181_v53 = vadd.f32 %v180_v52, %v2625_v24 }
  0xf7   :  { %v182_v57 = vpop.f32.mrf.mxu0 }
  0xf8   :  { %v183_v59 = vadd.f32 %v182_v57, %v2631_v31 }
  0xff   :  { %v2185_v36 = vpop.eup %2184 }
 0x100   :  { %v335_v37 = vadd.f32 1.0, %v2185_v36  ;;  %v2187_v38 = vpop.eup %2186 }
 0x102   :  { %2188 = vrcp.f32 %v335_v37 }
 0x103   :  { %2190 = vpow2.f32 %v2125_v42 }
 0x10f   :  { %v2189_v39 = vpop.eup %2188 }
 0x110   :  { %v346_v40 = vmul.f32 %v2189_v39, %v2187_v38  ;;  %v2191_v43 = vpop.eup %2190  ;;  %v345_v45 = vmul.f32 0.0, %v2189_v39 }
 0x111   :  { %v342_v44 = vadd.f32 1.0, %v2191_v43 }
 0x112   :  { %348 = vrot.lane.b32.xlu0 %v346_v40, %s2425_s3  ;;  %v186_v40 = vpop.f32.mrf.mxu0 }
 0x113   :  { %2192 = vrcp.f32 %v342_v44  ;;  %v187_v52 = vadd.f32 %v186_v40, %v2625_v24 }
 0x114   :  { %v188_v41 = vpop.f32.mrf.mxu0 }
 0x115   :  { %v189_v57 = vadd.f32 %v188_v41, %v2631_v31 }
 0x116   :  { %v192_v42 = vpop.f32.mrf.mxu0 }
 0x118   :  { %v2717_v43 = vpop.f32.mrf.mxu0 }
 0x11a   :  { %v2719_v44 = vpop.f32.mrf.mxu0 }
 0x120   :  { %v2193_v48 = vpop.eup %2192 }
 0x184   :  { %v349_v46 = vpop.permute.xlu0 %348 }
 0x185   :  { %v2640_v47 = vadd.f32 %v349_v46, %v345_v45  ;;  %v2721_v45 = vpop.f32.mrf.mxu0 }
 0x187   :  { %2194 = vtanh.f32 %v2640_v47 }
 0x194   :  { %v2195_v49 = vpop.eup %2194 }
 0x195   :  { %v353_v50 = vmul.f32 %v2195_v49, %v2193_v48 }
 0x197   :  { %355 = vrot.lane.b32.xlu0 %v353_v50, %s2425_s3 }
 0x1a2   :  { %v2723_v46 = vpop.f32.mrf.mxu0 }
 0x209   :  { %v356_v51 = vpop.permute.xlu0 %355 }
 0x20a   :  { %358 = vst.msk [vmem:[#allocation4] sm:$0xff] %vm255_vm2, %v356_v51  ;;  %2126 = vmatmul.mubr.msk.f32.vlgmr.msra.gmra.mxu1 %vm255_vm2, %v356_v51 }
 0x20b   :  { %588 = vmatpush1.msra.mxu1 %v2482_v2  ;;  %635 = vmatprep.mubr.f32.mxu1 %v2424_v0 }
 0x20c   :  { %589 = vmatprep.subr.mxu1 %v2487_v3 }
 0x20d   :  { %590 = vmatpush1.msra.mxu1 %v2493_v4 }
 0x20e   :  { %591 = vmatprep.subr.mxu1 %v2499_v5 }
 0x20f   :  { %592 = vmatpush1.msra.mxu1 %v2505_v6 }
 0x210   :  { %593 = vmatprep.subr.mxu1 %v2514_v8 }
 0x211   :  { %594 = vmatpush1.msra.mxu1 %v2526_v11 }
 0x212   :  { %595 = vmatprep.subr.mxu1 %v2532_v12 }
 0x213   :  { %596 = vmatpush1.msra.mxu1 %v2539_v13 }
 0x214   :  { %597 = vmatprep.subr.mxu1 %v2546_v14 }
 0x215   :  { %598 = vmatpush1.msra.mxu1 %v2553_v15 }
 0x216   :  { %599 = vmatprep.subr.mxu1 %v2560_v16 }
 0x217   :  { %600 = vmatpush1.msra.mxu1 %v2567_v17 }
 0x218   :  { %601 = vmatprep.subr.mxu1 %v2574_v18 }
 0x219   :  { %602 = vmatpush1.msra.mxu1 %v2581_v19 }
 0x21a   :  { %795 = vmatprep.subr.mxu1 %v2477_v1 }
 0x2ca   :  { %v429_v54 = vpop.f32.mrf.mxu1 }
 0x2cb   :  { %v434_v55 = vadd.f32 %v429_v54, %v181_v53 }
 0x2cc   :  { %v431_v58 = vpop.f32.mrf.mxu1 }
 0x2cd   :  { %v2127_v56 = vmul.f32 -1.442695, %v434_v55  ;;  %v435_v60 = vadd.f32 %v431_v58, %v183_v59 }
 0x2cf   :  { %2196 = vpow2.f32 %v2127_v56  ;;  %v2128_v28 = vmul.f32 -1.442695, %v435_v60 }
 0x2d0   :  { %2198 = vtanh.f32 %v435_v60 }
 0x2dc   :  { %v2197_v61 = vpop.eup %2196 }
 0x2dd   :  { %v439_v62 = vadd.f32 1.0, %v2197_v61  ;;  %v2199_v63 = vpop.eup %2198 }
 0x2df   :  { %2200 = vrcp.f32 %v439_v62 }
 0x2e0   :  { %2202 = vpow2.f32 %v2128_v28 }
 0x2ec   :  { %v2201_v7 = vpop.eup %2200 }
 0x2ed   :  { %v450_v9 = vmul.f32 %v2201_v7, %v2199_v63  ;;  %v2203_v29 = vpop.eup %2202  ;;  %v449_v33 = vmul.f32 %v2201_v7, %v2640_v47  ;;  %v2725_v47 = vpop.f32.mrf.mxu0 }
 0x2ee   :  { %v446_v32 = vadd.f32 1.0, %v2203_v29 }
 0x2ef   :  { %452 = vrot.lane.b32.xlu1 %v450_v9, %s2425_s3  ;;  %v2727_v48 = vpop.f32.mrf.mxu0 }
 0x2f0   :  { %2204 = vrcp.f32 %v446_v32  ;;  %v193_v32 = vadd.f32 %v192_v42, %v2625_v24 }
 0x2f1   :  { %v2729_v49 = vpop.f32.mrf.mxu0 }
 0x2f3   :  { %v2731_v50 = vpop.f32.mrf.mxu0 }
 0x2f5   :  { %v2733_v51 = vpop.f32.mrf.mxu0 }
 0x2fd   :  { %v2205_v36 = vpop.eup %2204 }
 0x361   :  { %v453_v34 = vpop.permute.xlu1 %452 }
 0x362   :  { %v455_v35 = vadd.f32 %v453_v34, %v449_v33 }
 0x364   :  { %2206 = vtanh.f32 %v455_v35 }
 0x371   :  { %v2207_v37 = vpop.eup %2206 }
 0x372   :  { %v457_v38 = vmul.f32 %v2207_v37, %v2205_v36  ;;  %v195_v37 = vadd.f32 %v2717_v43, %v2631_v31 }
 0x374   :  { %459 = vrot.lane.b32.xlu1 %v457_v38, %s2425_s3 }
 0x3e6   :  { %v460_v39 = vpop.permute.xlu1 %459 }
 0x3e7   :  { %462 = vst.msk [vmem:[#allocation4 + $0x8] sm:$0xff] %vm255_vm2, %v460_v39  ;;  %2129 = vmatmul.mubr.msk.f32.vlgmr.msra.gmra.mxu0 %vm255_vm2, %v460_v39 }
 0x3e8   :  { %692 = vmatpush1.msra.mxu0 %v2482_v2  ;;  %739 = vmatprep.mubr.f32.mxu0 %v2424_v0 }
 0x3e9   :  { %693 = vmatprep.subr.mxu0 %v2487_v3 }
 0x3ea   :  { %694 = vmatpush1.msra.mxu0 %v2493_v4 }
 0x3eb   :  { %695 = vmatprep.subr.mxu0 %v2499_v5 }
 0x3ec   :  { %696 = vmatpush1.msra.mxu0 %v2505_v6 }
 0x3ed   :  { %697 = vmatprep.subr.mxu0 %v2514_v8 }
 0x3ee   :  { %698 = vmatpush1.msra.mxu0 %v2526_v11 }
 0x3ef   :  { %699 = vmatprep.subr.mxu0 %v2532_v12 }
 0x3f0   :  { %700 = vmatpush1.msra.mxu0 %v2539_v13 }
 0x3f1   :  { %701 = vmatprep.subr.mxu0 %v2546_v14 }
 0x3f2   :  { %702 = vmatpush1.msra.mxu0 %v2553_v15 }
 0x3f3   :  { %703 = vmatprep.subr.mxu0 %v2560_v16 }
 0x3f4   :  { %704 = vmatpush1.msra.mxu0 %v2567_v17 }
 0x3f5   :  { %705 = vmatprep.subr.mxu0 %v2574_v18 }
 0x3f6   :  { %706 = vmatpush1.msra.mxu0 %v2581_v19 }
 0x3f7   :  { %899 = vmatprep.subr.mxu0 %v2477_v1 }
 0x4a7   :  { %v533_v53 = vpop.f32.mrf.mxu0 }
 0x4a8   :  { %v538_v54 = vadd.f32 %v533_v53, %v187_v52 }
 0x4a9   :  { %v535_v56 = vpop.f32.mrf.mxu0 }
 0x4aa   :  { %v2130_v55 = vmul.f32 -1.442695, %v538_v54  ;;  %v539_v58 = vadd.f32 %v535_v56, %v189_v57 }
 0x4ac   :  { %2208 = vpow2.f32 %v2130_v55  ;;  %v2131_v7 = vmul.f32 -1.442695, %v539_v58 }
 0x4ad   :  { %2210 = vtanh.f32 %v539_v58 }
 0x4b9   :  { %v2209_v59 = vpop.eup %2208 }
 0x4ba   :  { %v543_v60 = vadd.f32 1.0, %v2209_v59  ;;  %v2211_v61 = vpop.eup %2210 }
 0x4bc   :  { %2212 = vrcp.f32 %v543_v60 }
 0x4bd   :  { %2214 = vpow2.f32 %v2131_v7 }
 0x4c9   :  { %v2213_v62 = vpop.eup %2212 }
 0x4ca   :  { %v554_v63 = vmul.f32 %v2213_v62, %v2211_v61  ;;  %v2215_v9 = vpop.eup %2214  ;;  %v553_v20 = vmul.f32 %v2213_v62, %v455_v35  ;;  %v199_v61 = vadd.f32 %v2719_v44, %v2625_v24 }
 0x4cb   :  { %v550_v10 = vadd.f32 1.0, %v2215_v9 }
 0x4cc   :  { %556 = vrot.lane.b32.xlu0 %v554_v63, %s2425_s3 }
 0x4cd   :  { %2216 = vrcp.f32 %v550_v10  ;;  %v201_v10 = vadd.f32 %v2721_v45, %v2631_v31 }
 0x4da   :  { %v2217_v26 = vpop.eup %2216 }
 0x53e   :  { %v557_v23 = vpop.permute.xlu0 %556 }
 0x53f   :  { %v559_v25 = vadd.f32 %v557_v23, %v553_v20 }
 0x541   :  { %2218 = vtanh.f32 %v559_v25 }
 0x54e   :  { %v2219_v27 = vpop.eup %2218 }
 0x54f   :  { %v561_v28 = vmul.f32 %v2219_v27, %v2217_v26 }
 0x551   :  { %563 = vrot.lane.b32.xlu1 %v561_v28, %s2425_s3 }
 0x5c3   :  { %v564_v29 = vpop.permute.xlu1 %563 }
 0x5c4   :  { %566 = vst.msk [vmem:[#allocation4 + $0x10] sm:$0xff] %vm255_vm2, %v564_v29  ;;  %2132 = vmatmul.mubr.msk.f32.vlgmr.msra.gmra.mxu1 %vm255_vm2, %v564_v29 }
 0x5c5   :  { %796 = vmatpush1.msra.mxu1 %v2482_v2  ;;  %843 = vmatprep.mubr.f32.mxu1 %v2424_v0 }
 0x5c6   :  { %797 = vmatprep.subr.mxu1 %v2487_v3 }
 0x5c7   :  { %798 = vmatpush1.msra.mxu1 %v2493_v4 }
 0x5c8   :  { %799 = vmatprep.subr.mxu1 %v2499_v5 }
 0x5c9   :  { %800 = vmatpush1.msra.mxu1 %v2505_v6 }
 0x5ca   :  { %801 = vmatprep.subr.mxu1 %v2514_v8 }
 0x5cb   :  { %802 = vmatpush1.msra.mxu1 %v2526_v11 }
 0x5cc   :  { %803 = vmatprep.subr.mxu1 %v2532_v12 }
 0x5cd   :  { %804 = vmatpush1.msra.mxu1 %v2539_v13 }
 0x5ce   :  { %805 = vmatprep.subr.mxu1 %v2546_v14 }
 0x5cf   :  { %806 = vmatpush1.msra.mxu1 %v2553_v15 }
 0x5d0   :  { %807 = vmatprep.subr.mxu1 %v2560_v16 }
 0x5d1   :  { %808 = vmatpush1.msra.mxu1 %v2567_v17 }
 0x5d2   :  { %809 = vmatprep.subr.mxu1 %v2574_v18 }
 0x5d3   :  { %810 = vmatpush1.msra.mxu1 %v2581_v19 }
 0x5d4   :  { %1003 = vmatprep.subr.mxu1 %v2477_v1 }
 0x684   :  { %v637_v33 = vpop.f32.mrf.mxu1 }
 0x685   :  { %v642_v34 = vadd.f32 %v637_v33, %v193_v32 }
 0x686   :  { %v639_v36 = vpop.f32.mrf.mxu1 }
 0x687   :  { %v2133_v35 = vmul.f32 -1.442695, %v642_v34  ;;  %v643_v38 = vadd.f32 %v639_v36, %v195_v37 }
 0x689   :  { %2220 = vpow2.f32 %v2133_v35  ;;  %v2134_v1 = vmul.f32 -1.442695, %v643_v38 }
 0x68a   :  { %2222 = vtanh.f32 %v643_v38 }
 0x696   :  { %v2221_v39 = vpop.eup %2220 }
 0x697   :  { %v647_v40 = vadd.f32 1.0, %v2221_v39  ;;  %v2223_v41 = vpop.eup %2222 }
 0x699   :  { %2224 = vrcp.f32 %v647_v40 }
 0x69a   :  { %2226 = vpow2.f32 %v2134_v1  ;;  %v1109_v1 = vld [vmem:[#allocation5 + $0x70] sm:$0xff] }
 0x6a6   :  { %v2225_v52 = vpop.eup %2224 }
 0x6a7   :  { %v658_v53 = vmul.f32 %v2225_v52, %v2223_v41  ;;  %v2227_v42 = vpop.eup %2226  ;;  %v657_v55 = vmul.f32 %v2225_v52, %v559_v25 }
 0x6a8   :  { %v654_v54 = vadd.f32 1.0, %v2227_v42 }
 0x6a9   :  { %660 = vrot.lane.b32.xlu0 %v658_v53, %s2425_s3 }
 0x6aa   :  { %2228 = vrcp.f32 %v654_v54  ;;  %v1108_v54 = vld [vmem:[#allocation5 + $0x68] sm:$0xff] }
 0x6b7   :  { %v2229_v43 = vpop.eup %2228 }
 0x71b   :  { %v661_v56 = vpop.permute.xlu0 %660 }
 0x71c   :  { %v663_v57 = vadd.f32 %v661_v56, %v657_v55  ;;  %v1107_v55 = vld [vmem:[#allocation5 + $0x60] sm:$0xff]  ;;  %v1106_v56 = vld [vmem:[#allocation5 + $0x58] sm:$0xff] }
 0x71e   :  { %2230 = vtanh.f32 %v663_v57 }
 0x72b   :  { %v2231_v58 = vpop.eup %2230 }
 0x72c   :  { %v665_v59 = vmul.f32 %v2231_v58, %v2229_v43  ;;  %v1104_v43 = vld [vmem:[#allocation5 + $0x48] sm:$0xff]  ;;  %v1103_v58 = vld [vmem:[#allocation5 + $0x40] sm:$0xff] }
 0x72e   :  { %667 = vrot.lane.b32.xlu1 %v665_v59, %s2425_s3  ;;  %v1102_v59 = vld [vmem:[#allocation5 + $0x38] sm:$0xff] }
 0x7a0   :  { %v668_v60 = vpop.permute.xlu1 %667 }
 0x7a1   :  { %670 = vst.msk [vmem:[#allocation4 + $0x18] sm:$0xff] %vm255_vm2, %v668_v60  ;;  %2135 = vmatmul.mubr.msk.f32.vlgmr.msra.gmra.mxu0 %vm255_vm2, %v668_v60  ;;  %v1101_v60 = vld [vmem:[#allocation5 + $0x30] sm:$0xff] }
 0x7a2   :  { %900 = vmatpush1.msra.mxu0 %v2482_v2  ;;  %947 = vmatprep.mubr.f32.mxu0 %v2424_v0 }
 0x7a3   :  { %901 = vmatprep.subr.mxu0 %v2487_v3 }
 0x7a4   :  { %902 = vmatpush1.msra.mxu0 %v2493_v4 }
 0x7a5   :  { %903 = vmatprep.subr.mxu0 %v2499_v5 }
 0x7a6   :  { %904 = vmatpush1.msra.mxu0 %v2505_v6 }
 0x7a7   :  { %905 = vmatprep.subr.mxu0 %v2514_v8 }
 0x7a8   :  { %906 = vmatpush1.msra.mxu0 %v2526_v11 }
 0x7a9   :  { %907 = vmatprep.subr.mxu0 %v2532_v12 }
 0x7aa   :  { %908 = vmatpush1.msra.mxu0 %v2539_v13 }
 0x7ab   :  { %909 = vmatprep.subr.mxu0 %v2546_v14 }
 0x7ac   :  { %910 = vmatpush1.msra.mxu0 %v2553_v15 }
 0x7ad   :  { %911 = vmatprep.subr.mxu0 %v2560_v16 }
 0x7ae   :  { %912 = vmatpush1.msra.mxu0 %v2567_v17 }
 0x7af   :  { %913 = vmatprep.subr.mxu0 %v2574_v18 }
 0x7b0   :  { %914 = vmatpush1.msra.mxu0 %v2581_v19 }
 0x861   :  { %v741_v62 = vpop.f32.mrf.mxu0 }
 0x862   :  { %v746_v63 = vadd.f32 %v741_v62, %v199_v61  ;;  %v1100_v61 = vld [vmem:[#allocation5 + $0x28] sm:$0xff]  ;;  %v1099_v62 = vld [vmem:[#allocation5 + $0x20] sm:$0xff] }
 0x863   :  { %v743_v9 = vpop.f32.mrf.mxu0 }
 0x864   :  { %v2136_v7 = vmul.f32 -1.442695, %v746_v63  ;;  %v747_v20 = vadd.f32 %v743_v9, %v201_v10  ;;  %v1098_v63 = vld [vmem:[#allocation5 + $0x18] sm:$0xff]  ;;  %v1096_v9 = vld [vmem:[#allocation5 + $0x8] sm:$0xff]  ;;  %v1095_v10 = vld [vmem:[#allocation5] sm:$0xff] }
 0x866   :  { %2232 = vpow2.f32 %v2136_v7  ;;  %v2137_v29 = vmul.f32 -1.442695, %v747_v20  ;;  %v1097_v7 = vld [vmem:[#allocation5 + $0x10] sm:$0xff] }
 0x867   :  { %2234 = vtanh.f32 %v747_v20  ;;  %v1087_v20 = vld [vmem:[#allocation4] sm:$0xff] }
 0x873   :  { %v2233_v23 = vpop.eup %2232 }
 0x874   :  { %v751_v25 = vadd.f32 1.0, %v2233_v23  ;;  %v2235_v26 = vpop.eup %2234  ;;  %v1088_v23 = vld [vmem:[#allocation4 + $0x8] sm:$0xff] }
 0x876   :  { %2236 = vrcp.f32 %v751_v25  ;;  %v1089_v25 = vld [vmem:[#allocation4 + $0x10] sm:$0xff] }
 0x877   :  { %2238 = vpow2.f32 %v2137_v29  ;;  %v211_v29 = vadd.f32 %v2727_v48, %v2625_v24 }
 0x883   :  { %v2237_v27 = vpop.eup %2236 }
 0x884   :  { %v762_v28 = vmul.f32 %v2237_v27, %v2235_v26  ;;  %v2239_v44 = vpop.eup %2238  ;;  %v761_v33 = vmul.f32 %v2237_v27, %v663_v57  ;;  %v1105_v57 = vld [vmem:[#allocation5 + $0x50] sm:$0xff]  ;;  %v1090_v26 = vld [vmem:[#allocation4 + $0x18] sm:$0xff] }
 0x885   :  { %v758_v32 = vadd.f32 1.0, %v2239_v44 }
 0x886   :  { %764 = vrot.lane.b32.xlu0 %v762_v28, %s2425_s3 }
 0x887   :  { %2240 = vrcp.f32 %v758_v32 }
 0x894   :  { %v2241_v45 = vpop.eup %2240 }
 0x8f8   :  { %v765_v34 = vpop.permute.xlu0 %764 }
 0x8f9   :  { %v767_v35 = vadd.f32 %v765_v34, %v761_v33 }
 0x8fb   :  { %2242 = vtanh.f32 %v767_v35 }
 0x908   :  { %v2243_v36 = vpop.eup %2242 }
 0x909   :  { %v769_v37 = vmul.f32 %v2243_v36, %v2241_v45 }
 0x90b   :  { %771 = vrot.lane.b32.xlu1 %v769_v37, %s2425_s3 }
 0x97d   :  { %v772_v38 = vpop.permute.xlu1 %771 }
 0x97e   :  { %774 = vst.msk [vmem:[#allocation4 + $0x20] sm:$0xff] %vm255_vm2, %v772_v38  ;;  %2138 = vmatmul.mubr.msk.f32.vlgmr.msra.gmra.mxu1 %vm255_vm2, %v772_v38 }
 0x97f   :  { %1004 = vmatpush1.msra.mxu1 %v2482_v2  ;;  %1051 = vmatprep.mubr.f32.mxu1 %v2424_v0  ;;  %v205_v2 = vadd.f32 %v2723_v46, %v2625_v24 }
 0x980   :  { %1005 = vmatprep.subr.mxu1 %v2487_v3 }
 0x981   :  { %1006 = vmatpush1.msra.mxu1 %v2493_v4 }
 0x982   :  { %1007 = vmatprep.subr.mxu1 %v2499_v5 }
 0x983   :  { %1008 = vmatpush1.msra.mxu1 %v2505_v6 }
 0x984   :  { %1009 = vmatprep.subr.mxu1 %v2514_v8  ;;  %v207_v8 = vadd.f32 %v2725_v47, %v2631_v31 }
 0x985   :  { %1010 = vmatpush1.msra.mxu1 %v2526_v11  ;;  %v1091_v27 = vld [vmem:[#allocation4 + $0x20] sm:$0xff] }
 0x986   :  { %1011 = vmatprep.subr.mxu1 %v2532_v12 }
 0x987   :  { %1012 = vmatpush1.msra.mxu1 %v2539_v13 }
 0x988   :  { %1013 = vmatprep.subr.mxu1 %v2546_v14 }
 0x989   :  { %1014 = vmatpush1.msra.mxu1 %v2553_v15 }
 0x98a   :  { %1015 = vmatprep.subr.mxu1 %v2560_v16 }
 0x98b   :  { %1016 = vmatpush1.msra.mxu1 %v2567_v17  ;;  %v1110_v17 = vld [vmem:[#allocation5 + $0x78] sm:$0xff] }
 0x98c   :  { %1017 = vmatprep.subr.mxu1 %v2574_v18  ;;  %1163 = vmatprep.subr.mxu0 %v1110_v17  ;;  %v2856_v17 = vld [vmem:[#allocation7 + $0x48] sm:$0xff] }
 0x98d   :  { %1018 = vmatpush1.msra.mxu1 %v2581_v19 }
 0xa3e   :  { %v845_v3 = vpop.f32.mrf.mxu1 }
 0xa3f   :  { %v850_v4 = vadd.f32 %v845_v3, %v205_v2 }
 0xa40   :  { %v847_v6 = vpop.f32.mrf.mxu1 }
 0xa41   :  { %v2139_v5 = vmul.f32 -1.442695, %v850_v4  ;;  %v851_v11 = vadd.f32 %v847_v6, %v207_v8  ;;  %v2834_v4 = vld [vmem:[#allocation7 + $0x78] sm:$0xff] }
 0xa42   :  { %1310 = vmatprep.subr.mxu1 %v2834_v4 }
 0xa43   :  { %2244 = vpow2.f32 %v2139_v5  ;;  %v2140_v18 = vmul.f32 -1.442695, %v851_v11 }
 0xa44   :  { %2246 = vtanh.f32 %v851_v11 }
 0xa50   :  { %v2245_v12 = vpop.eup %2244 }
 0xa51   :  { %v855_v13 = vadd.f32 1.0, %v2245_v12  ;;  %v2247_v14 = vpop.eup %2246  ;;  %v2842_v12 = vld [vmem:[#allocation7 + $0x70] sm:$0xff] }
 0xa53   :  { %2248 = vrcp.f32 %v855_v13  ;;  %v2844_v13 = vld [vmem:[#allocation7 + $0x68] sm:$0xff] }
 0xa54   :  { %2250 = vpow2.f32 %v2140_v18  ;;  %v2859_v18 = vld [vmem:[#allocation7 + $0x40] sm:$0xff] }
 0xa60   :  { %v2249_v15 = vpop.eup %2248 }
 0xa61   :  { %v866_v16 = vmul.f32 %v2249_v15, %v2247_v14  ;;  %v2251_v19 = vpop.eup %2250  ;;  %v865_v39 = vmul.f32 %v2249_v15, %v767_v35  ;;  %v213_v35 = vadd.f32 %v2729_v49, %v2631_v31  ;;  %v2847_v14 = vld [vmem:[#allocation7 + $0x60] sm:$0xff]  ;;  %v2850_v15 = vld [vmem:[#allocation7 + $0x58] sm:$0xff] }
 0xa62   :  { %v862_v46 = vadd.f32 1.0, %v2251_v19  ;;  %v2862_v19 = vld [vmem:[#allocation7 + $0x38] sm:$0xff] }
 0xa63   :  { %868 = vrot.lane.b32.xlu0 %v866_v16, %s2425_s3  ;;  %v2853_v16 = vld [vmem:[#allocation7 + $0x50] sm:$0xff] }
 0xa64   :  { %2252 = vrcp.f32 %v862_v46  ;;  %v2865_v46 = vld [vmem:[#allocation7 + $0x30] sm:$0xff] }
 0xa71   :  { %v2253_v47 = vpop.eup %2252 }
 0xad5   :  { %v869_v40 = vpop.permute.xlu0 %868 }
 0xad6   :  { %v2810_v41 = vadd.f32 %v869_v40, %v865_v39  ;;  %v2868_v40 = vld [vmem:[#allocation7 + $0x28] sm:$0xff] }
 0xad8   :  { %2254 = vtanh.f32 %v2810_v41 }
 0xae5   :  { %v2255_v52 = vpop.eup %2254 }
 0xae6   :  { %v873_v53 = vmul.f32 %v2255_v52, %v2253_v47  ;;  %v2871_v47 = vld [vmem:[#allocation7 + $0x20] sm:$0xff] }
 0xae8   :  { %875 = vrot.lane.b32.xlu1 %v873_v53, %s2425_s3  ;;  %v2874_v53 = vld [vmem:[#allocation7 + $0x18] sm:$0xff] }
 0xb5a   :  { %v876_v42 = vpop.permute.xlu1 %875 }
 0xb5b   :  { %878 = vst.msk [vmem:[#allocation4 + $0x28] sm:$0xff] %vm255_vm2, %v876_v42  ;;  %2141 = vmatmul.mubr.msk.f32.vlgmr.msra.gmra.mxu0 %vm255_vm2, %v876_v42  ;;  %v2881_v42 = vld [vmem:[#allocation7 + $0x8] sm:$0xff] }
 0xb5c   :  { %1164 = vmatpush1.msra.mxu0 %v1109_v1  ;;  %1211 = vmatprep.mubr.f32.mxu0 %v2424_v0  ;;  %v2877_v1 = vld [vmem:[#allocation7 + $0x10] sm:$0xff] }
 0xb5d   :  { %1165 = vmatprep.subr.mxu0 %v1108_v54  ;;  %v2884_v54 = vld [vmem:[#allocation7] sm:$0xff] }
 0xb5e   :  { %1166 = vmatpush1.msra.mxu0 %v1107_v55 }
 0xb5f   :  { %1167 = vmatprep.subr.mxu0 %v1106_v56 }
 0xb60   :  { %1168 = vmatpush1.msra.mxu0 %v1105_v57  ;;  %v1111_v57 = vld [vmem:[%s3112_s6] sm:$0x3] }
 0xb61   :  { %1169 = vmatprep.subr.mxu0 %v1104_v43 }
 0xb62   :  { %1170 = vmatpush1.msra.mxu0 %v1103_v58  ;;  %v1092_v28 = vld [vmem:[#allocation4 + $0x28] sm:$0xff]  ;;  %v217_v58 = vadd.f32 %v2731_v50, %v2625_v24 }
 0xb63   :  { %1171 = vmatprep.subr.mxu0 %v1102_v59  ;;  %v2935_v59 = vrot.slane %v1111_v57, %v68_v22 }
 0xb64   :  { %1172 = vmatpush1.msra.mxu0 %v1101_v60 }
 0xb65   :  { %1173 = vmatprep.subr.mxu0 %v1100_v61 }
 0xb66   :  { %1174 = vmatpush1.msra.mxu0 %v1099_v62 }
 0xb67   :  { %1175 = vmatprep.subr.mxu0 %v1098_v63 }
 0xb68   :  { %1176 = vmatpush1.msra.mxu0 %v1097_v7 }
 0xb69   :  { %1177 = vmatprep.subr.mxu0 %v1096_v9 }
 0xb6a   :  { %1178 = vmatpush1.msra.mxu0 %v1095_v10 }
 0xb6b   :  { %2147 = vmatmul.mubr.msk.f32.vlgmr.msra.gmra.mxu0 %vm255_vm2, %v1087_v20  ;;  %1514 = vmatprep.subr.mxu0 %v2834_v4 }
 0xb6c   :  { %1217 = vmatprep.mubr.f32.mxu0 %v2424_v0  ;;  %1515 = vmatpush1.msra.mxu0 %v2842_v12 }
 0xb6d   :  { %1516 = vmatprep.subr.mxu0 %v2844_v13 }
 0xb6e   :  { %1517 = vmatpush1.msra.mxu0 %v2847_v14 }
 0xb6f   :  { %2148 = vmatmul.mubr.msk.f32.gmra.mxu0 %vm255_vm2, %v1088_v23  ;;  %1518 = vmatprep.subr.mxu0 %v2850_v15  ;;  %v2940_v23 = vrot.slane %v1111_v57, %v72_v30 }
 0xb70   :  { %1223 = vmatprep.mubr.f32.mxu0 %v2424_v0  ;;  %1519 = vmatpush1.msra.mxu0 %v2853_v16 }
 0xb71   :  { %1520 = vmatprep.subr.mxu0 %v2856_v17 }
 0xb72   :  { %1521 = vmatpush1.msra.mxu0 %v2859_v18 }
 0xb73   :  { %2149 = vmatmul.mubr.msk.f32.gmra.mxu0 %vm255_vm2, %v1089_v25  ;;  %1522 = vmatprep.subr.mxu0 %v2862_v19 }
 0xb74   :  { %1229 = vmatprep.mubr.f32.mxu0 %v2424_v0  ;;  %1523 = vmatpush1.msra.mxu0 %v2865_v46 }
 0xb75   :  { %1524 = vmatprep.subr.mxu0 %v2868_v40 }
 0xb76   :  { %1525 = vmatpush1.msra.mxu0 %v2871_v47 }
 0xb77   :  { %2150 = vmatmul.mubr.msk.f32.gmra.mxu0 %vm255_vm2, %v1090_v26  ;;  %1526 = vmatprep.subr.mxu0 %v2874_v53 }
 0xb78   :  { %1235 = vmatprep.mubr.f32.mxu0 %v2424_v0  ;;  %1527 = vmatpush1.msra.mxu0 %v2877_v1 }
 0xb79   :  { %1528 = vmatprep.subr.mxu0 %v2881_v42 }
 0xb7a   :  { %1529 = vmatpush1.msra.mxu0 %v2884_v54 }
 0xb7b   :  { %2151 = vmatmul.mubr.msk.f32.gmra.mxu0 %vm255_vm2, %v1091_v27  ;;  %1718 = vmatprep.subr.mxu0 %v2834_v4 }
 0xb7c   :  { %1241 = vmatprep.mubr.f32.mxu0 %v2424_v0 }
 0xb7f   :  { %2152 = vmatmul.mubr.msk.f32.gmra.mxu0 %vm255_vm2, %v1092_v28  ;;  %v219_v28 = vadd.f32 %v2733_v51, %v2631_v31 }
 0xb80   :  { %1247 = vmatprep.mubr.f32.mxu0 %v2424_v0 }
 0xc1b   :  { %v949_v44 = vpop.f32.mrf.mxu0 }
 0xc1c   :  { %v954_v32 = vadd.f32 %v949_v44, %v211_v29 }
 0xc1d   :  { %v951_v34 = vpop.f32.mrf.mxu0 }
 0xc1e   :  { %v2142_v33 = vmul.f32 -1.442695, %v954_v32  ;;  %v955_v45 = vadd.f32 %v951_v34, %v213_v35 }
 0xc20   :  { %2256 = vpow2.f32 %v2142_v33  ;;  %v2143_v48 = vmul.f32 -1.442695, %v955_v45 }
 0xc21   :  { %2258 = vtanh.f32 %v955_v45 }
 0xc2b   :  { %v1213_v60 = vpop.f32.mrf.mxu0 }
 0xc2c   :  { %v1214_v63 = vadd.f32 %v1213_v60, %v2935_v59 }
 0xc2d   :  { %v2257_v36 = vpop.eup %2256  ;;  %v1215_v24 = vpop.f32.mrf.mxu0 }
 0xc2e   :  { %v959_v37 = vadd.f32 1.0, %v2257_v36  ;;  %v2259_v38 = vpop.eup %2258  ;;  %v1216_v22 = vadd.f32 %v1215_v24, %v2940_v23 }
 0xc2f   :  { %v1219_v60 = vpop.f32.mrf.mxu0 }
 0xc30   :  { %2260 = vrcp.f32 %v959_v37 }
 0xc31   :  { %2262 = vpow2.f32 %v2143_v48 }
 0xc3d   :  { %v2261_v2 = vpop.eup %2260 }
 0xc3e   :  { %v970_v3 = vmul.f32 %v2261_v2, %v2259_v38  ;;  %v2263_v5 = vpop.eup %2262  ;;  %v969_v6 = vmul.f32 %v2261_v2, %v2810_v41 }
 0xc3f   :  { %v966_v49 = vadd.f32 1.0, %v2263_v5 }
 0xc40   :  { %972 = vrot.lane.b32.xlu0 %v970_v3, %s2425_s3 }
 0xc41   :  { %2264 = vrcp.f32 %v966_v49 }
 0xc4e   :  { %v2265_v39 = vpop.eup %2264 }
 0xcb2   :  { %v973_v8 = vpop.permute.xlu0 %972 }
 0xcb3   :  { %v2839_v11 = vadd.f32 %v973_v8, %v969_v6 }
 0xcb5   :  { %2266 = vtanh.f32 %v2839_v11 }
 0xcc2   :  { %v2267_v41 = vpop.eup %2266 }
 0xcc3   :  { %v977_v52 = vmul.f32 %v2267_v41, %v2265_v39 }
 0xcc5   :  { %979 = vrot.lane.b32.xlu1 %v977_v52, %s2425_s3 }
 0xd37   :  { %v980_v55 = vpop.permute.xlu1 %979 }
 0xd38   :  { %982 = vst.msk [vmem:[#allocation4 + $0x30] sm:$0xff] %vm255_vm2, %v980_v55  ;;  %2144 = vmatmul.mubr.msk.f32.vlgmr.msra.gmra.mxu1 %vm255_vm2, %v980_v55 }
 0xd39   :  { %1311 = vmatpush1.msra.mxu1 %v2842_v12  ;;  %1358 = vmatprep.mubr.f32.mxu1 %v2424_v0 }
 0xd3a   :  { %1312 = vmatprep.subr.mxu1 %v2844_v13 }
 0xd3b   :  { %1313 = vmatpush1.msra.mxu1 %v2847_v14 }
 0xd3c   :  { %1314 = vmatprep.subr.mxu1 %v2850_v15 }
 0xd3d   :  { %1315 = vmatpush1.msra.mxu1 %v2853_v16 }
 0xd3e   :  { %1316 = vmatprep.subr.mxu1 %v2856_v17 }
 0xd3f   :  { %1317 = vmatpush1.msra.mxu1 %v2859_v18  ;;  %v1093_v56 = vld [vmem:[#allocation4 + $0x30] sm:$0xff] }
 0xd40   :  { %1318 = vmatprep.subr.mxu1 %v2862_v19  ;;  %2153 = vmatmul.mubr.msk.f32.gmra.mxu0 %vm255_vm2, %v1093_v56 }
 0xd41   :  { %1319 = vmatpush1.msra.mxu1 %v2865_v46  ;;  %1253 = vmatprep.mubr.f32.mxu0 %v2424_v0 }
 0xd42   :  { %1320 = vmatprep.subr.mxu1 %v2868_v40 }
 0xd43   :  { %1321 = vmatpush1.msra.mxu1 %v2871_v47 }
 0xd44   :  { %1322 = vmatprep.subr.mxu1 %v2874_v53 }
 0xd45   :  { %1323 = vmatpush1.msra.mxu1 %v2877_v1 }
 0xd46   :  { %1324 = vmatprep.subr.mxu1 %v2881_v42 }
 0xd47   :  { %1325 = vmatpush1.msra.mxu1 %v2884_v54 }
 0xd48   :  { %1359 = vmatmul.mubr.f32.vlgmr.msra.gmra.mxu1 %v2424_v0  ;;  %1412 = vmatprep.subr.mxu1 %v2834_v4 }
 0xd49   :  { %1413 = vmatpush1.msra.mxu1 %v2842_v12  ;;  %1460 = vmatprep.mubr.f32.mxu1 %v2424_v0 }
 0xd4a   :  { %1414 = vmatprep.subr.mxu1 %v2844_v13 }
 0xd4b   :  { %1415 = vmatpush1.msra.mxu1 %v2847_v14 }
 0xd4c   :  { %1416 = vmatprep.subr.mxu1 %v2850_v15 }
 0xd4d   :  { %1417 = vmatpush1.msra.mxu1 %v2853_v16 }
 0xd4e   :  { %1418 = vmatprep.subr.mxu1 %v2856_v17 }
 0xd4f   :  { %1419 = vmatpush1.msra.mxu1 %v2859_v18 }
 0xd50   :  { %1420 = vmatprep.subr.mxu1 %v2862_v19 }
 0xd51   :  { %1421 = vmatpush1.msra.mxu1 %v2865_v46 }
 0xd52   :  { %1422 = vmatprep.subr.mxu1 %v2868_v40 }
 0xd53   :  { %1423 = vmatpush1.msra.mxu1 %v2871_v47 }
 0xd54   :  { %1424 = vmatprep.subr.mxu1 %v2874_v53 }
 0xd55   :  { %1425 = vmatpush1.msra.mxu1 %v2877_v1 }
 0xd56   :  { %1426 = vmatprep.subr.mxu1 %v2881_v42 }
 0xd57   :  { %1427 = vmatpush1.msra.mxu1 %v2884_v54 }
 0xd58   :  { %1616 = vmatprep.subr.mxu1 %v2834_v4 }
 0xdf8   :  { %v1053_v43 = vpop.f32.mrf.mxu1 }
 0xdf9   :  { %v1058_v61 = vadd.f32 %v1053_v43, %v217_v58 }
 0xdfa   :  { %v1055_v62 = vpop.f32.mrf.mxu1 }
 0xdfb   :  { %v2145_v7 = vmul.f32 -1.442695, %v1058_v61  ;;  %v1059_v32 = vadd.f32 %v1055_v62, %v219_v28  ;;  %v1220_v61 = vadd.f32 %v1219_v60, %v2935_v59 }
 0xdfd   :  { %2268 = vpow2.f32 %v2145_v7  ;;  %v2146_v37 = vmul.f32 -1.442695, %v1059_v32 }
 0xe08   :  { %v1360_v9 = vpop.f32.mrf.mxu1 }
 0xe09   :  { %v1365_v10 = vadd.f32 %v1360_v9, %v1214_v63  ;;  %v1221_v9 = vpop.f32.mrf.mxu0 }
 0xe0a   :  { %v1362_v50 = vpop.f32.mrf.mxu1  ;;  %v2269_v25 = vpop.eup %2268 }
 0xe0b   :  { %v2155_v20 = vmul.f32 -1.442695, %v1365_v10  ;;  %v1366_v26 = vadd.f32 %v1362_v50, %v1216_v22  ;;  %v1063_v29 = vadd.f32 1.0, %v2269_v25 }
 0xe0d   :  { %2270 = vpow2.f32 %v2155_v20  ;;  %v2156_v36 = vmul.f32 -1.442695, %v1366_v26  ;;  %v1222_v20 = vadd.f32 %v1221_v9, %v2940_v23 }
 0xe0e   :  { %2272 = vtanh.f32 %v1366_v26 }
 0xe1a   :  { %v2271_v27 = vpop.eup %2270 }
 0xe1b   :  { %v1370_v44 = vadd.f32 1.0, %v2271_v27  ;;  %v2273_v21 = vpop.eup %2272 }
 0xe1d   :  { %2274 = vrcp.f32 %v1370_v44 }
 0xe1e   :  { %2276 = vrcp.f32 %v1063_v29 }
 0xe1f   :  { %2278 = vtanh.f32 %v1059_v32 }
 0xe20   :  { %2280 = vpow2.f32 %v2156_v36  ;;  %v1225_v36 = vpop.f32.mrf.mxu0 }
 0xe21   :  { %2282 = vpow2.f32 %v2146_v37 }
 0xe22   :  { %v1227_v37 = vpop.f32.mrf.mxu0 }
 0xe2a   :  { %v2275_v30 = vpop.eup %2274 }
 0xe2b   :  { %v1381_v33 = vmul.f32 %v2275_v30, %v2273_v21  ;;  %v2277_v34 = vpop.eup %2276  ;;  %v1380_v2 = vmul.f32 0.0, %v2275_v30 }
 0xe2c   :  { %v2279_v35 = vpop.eup %2278  ;;  %v1073_v49 = vmul.f32 %v2277_v34, %v2839_v11 }
 0xe2d   :  { %1383 = vrot.lane.b32.xlu0 %v1381_v33, %s2425_s3  ;;  %v1074_v45 = vmul.f32 %v2279_v35, %v2277_v34  ;;  %v2281_v31 = vpop.eup %2280 }
 0xe2e   :  { %v1377_v51 = vadd.f32 1.0, %v2281_v31  ;;  %v2283_v38 = vpop.eup %2282  ;;  %v1231_v31 = vpop.f32.mrf.mxu0 }
 0xe2f   :  { %v1070_v5 = vadd.f32 1.0, %v2283_v38 }
 0xe30   :  { %2284 = vrcp.f32 %v1377_v51  ;;  %v2997_v51 = vpop.f32.mrf.mxu0 }
 0xe31   :  { %1076 = vrot.lane.b32.xlu0 %v1074_v45, %s2425_s3 }
 0xe32   :  { %v2999_v38 = vpop.f32.mrf.mxu0 }
 0xe3d   :  { %v2285_v39 = vpop.eup %2284 }
 0xe9f   :  { %v1384_v3 = vpop.permute.xlu0 %1383 }
 0xea0   :  { %v2947_v48 = vadd.f32 %v1384_v3, %v1380_v2  ;;  %v3001_v2 = vpop.f32.mrf.mxu0 }
 0xea2   :  { %2286 = vtanh.f32 %v2947_v48  ;;  %v3003_v3 = vpop.f32.mrf.mxu0 }
 0xea3   :  { %v1077_v6 = vpop.permute.xlu0 %1076  ;;  %2288 = vrcp.f32 %v1070_v5 }
 0xea4   :  { %v1079_v8 = vadd.f32 %v1077_v6, %v1073_v49 }
 0xea6   :  { %2290 = vtanh.f32 %v1079_v8 }
 0xeaf   :  { %v2287_v41 = vpop.eup %2286 }
 0xeb0   :  { %v1388_v52 = vmul.f32 %v2287_v41, %v2285_v39  ;;  %v2289_v55 = vpop.eup %2288  ;;  %v1226_v39 = vadd.f32 %v1225_v36, %v2935_v59 }
 0xeb2   :  { %1392 = vrot.lane.b32.xlu1 %v1388_v52, %s2425_s3 }
 0xeb3   :  { %v2291_v56 = vpop.eup %2290 }
 0xeb4   :  { %v1081_v57 = vmul.f32 %v2291_v56, %v2289_v55 }
 0xeb6   :  { %1083 = vrot.lane.b32.xlu0 %v1081_v57, %s2425_s3  ;;  %v1228_v57 = vadd.f32 %v1227_v37, %v2940_v23 }
 0xf24   :  { %v1393_v43 = vpop.permute.xlu1 %1392 }
 0xf25   :  { %2157 = vmatmul.mubr.msk.f32.vlgmr.msra.gmra.mxu1 %vm255_vm2, %v1393_v43 }
 0xf26   :  { %1617 = vmatpush1.msra.mxu1 %v2842_v12  ;;  %1664 = vmatprep.mubr.f32.mxu1 %v2424_v0 }
 0xf27   :  { %1618 = vmatprep.subr.mxu1 %v2844_v13 }
 0xf28   :  { %v1084_v11 = vpop.permute.xlu0 %1083  ;;  %1619 = vmatpush1.msra.mxu1 %v2847_v14 }
 0xf29   :  { %1086 = vst.msk [vmem:[#allocation4 + $0x38] sm:$0xff] %vm255_vm2, %v1084_v11  ;;  %1620 = vmatprep.subr.mxu1 %v2850_v15 }
 0xf2a   :  { %1621 = vmatpush1.msra.mxu1 %v2853_v16 }
 0xf2b   :  { %1622 = vmatprep.subr.mxu1 %v2856_v17 }
 0xf2c   :  { %1623 = vmatpush1.msra.mxu1 %v2859_v18 }
 0xf2d   :  { %1624 = vmatprep.subr.mxu1 %v2862_v19 }
 0xf2e   :  { %1625 = vmatpush1.msra.mxu1 %v2865_v46 }
 0xf2f   :  { %1626 = vmatprep.subr.mxu1 %v2868_v40 }
 0xf30   :  { %v1094_v58 = vld [vmem:[#allocation4 + $0x38] sm:$0xff]  ;;  %1627 = vmatpush1.msra.mxu1 %v2871_v47 }
 0xf31   :  { %2154 = vmatmul.mubr.msk.f32.gmra.mxu0 %vm255_vm2, %v1094_v58  ;;  %1628 = vmatprep.subr.mxu1 %v2874_v53 }
 0xf32   :  { %1562 = vmatprep.mubr.f32.mxu0 %v2424_v0  ;;  %1629 = vmatpush1.msra.mxu1 %v2877_v1 }
 0xf33   :  { %1630 = vmatprep.subr.mxu1 %v2881_v42 }
 0xf34   :  { %1631 = vmatpush1.msra.mxu1 %v2884_v54 }
 0xf35   :  { %1820 = vmatprep.subr.mxu1 %v2834_v4 }
 0xfe5   :  { %v1462_v62 = vpop.f32.mrf.mxu1 }
 0xfe6   :  { %v1467_v63 = vadd.f32 %v1462_v62, %v1220_v61 }
 0xfe7   :  { %v1464_v10 = vpop.f32.mrf.mxu1 }
 0xfe8   :  { %v2158_v7 = vmul.f32 -1.442695, %v1467_v63  ;;  %v1468_v24 = vadd.f32 %v1464_v10, %v1222_v20 }
 0xfea   :  { %2292 = vpow2.f32 %v2158_v7  ;;  %v2159_v28 = vmul.f32 -1.442695, %v1468_v24 }
 0xfeb   :  { %2294 = vtanh.f32 %v1468_v24 }
 0xff7   :  { %v2293_v50 = vpop.eup %2292 }
 0xff8   :  { %v1472_v22 = vadd.f32 1.0, %v2293_v50  ;;  %v2295_v25 = vpop.eup %2294 }
 0xffa   :  { %2296 = vrcp.f32 %v1472_v22 }
 0xffb   :  { %2298 = vpow2.f32 %v2159_v28 }
0x1007   :  { %v2297_v26 = vpop.eup %2296 }
0x1008   :  { %v1483_v27 = vmul.f32 %v2297_v26, %v2295_v25  ;;  %v2299_v29 = vpop.eup %2298  ;;  %v1482_v32 = vmul.f32 %v2297_v26, %v2947_v48  ;;  %v3005_v48 = vpop.f32.mrf.mxu0 }
0x1009   :  { %v1479_v44 = vadd.f32 1.0, %v2299_v29 }
0x100a   :  { %1485 = vrot.lane.b32.xlu1 %v1483_v27, %s2425_s3  ;;  %v3007_v5 = vpop.f32.mrf.mxu0  ;;  %v1232_v27 = vadd.f32 %v1231_v31, %v2935_v59 }
0x100b   :  { %2300 = vrcp.f32 %v1479_v44 }
0x100c   :  { %v3009_v49 = vpop.f32.mrf.mxu0 }
0x100e   :  { %v3011_v6 = vpop.f32.mrf.mxu0 }
0x1010   :  { %v3013_v8 = vpop.f32.mrf.mxu0 }
0x1018   :  { %v2301_v33 = vpop.eup %2300 }
0x107c   :  { %v1486_v21 = vpop.permute.xlu1 %1485 }
0x107d   :  { %v1488_v30 = vadd.f32 %v1486_v21, %v1482_v32  ;;  %v1234_v21 = vadd.f32 %v2997_v51, %v2940_v23 }
0x107f   :  { %2302 = vtanh.f32 %v1488_v30 }
0x108c   :  { %v2303_v34 = vpop.eup %2302 }
0x108d   :  { %v1490_v35 = vmul.f32 %v2303_v34, %v2301_v33 }
0x108f   :  { %1494 = vrot.lane.b32.xlu1 %v1490_v35, %s2425_s3 }
0x1101   :  { %v1495_v45 = vpop.permute.xlu1 %1494 }
0x1102   :  { %2160 = vmatmul.mubr.msk.f32.vlgmr.msra.gmra.mxu0 %vm255_vm2, %v1495_v45 }
0x1103   :  { %1719 = vmatpush1.msra.mxu0 %v2842_v12  ;;  %1766 = vmatprep.mubr.f32.mxu0 %v2424_v0 }
0x1104   :  { %1720 = vmatprep.subr.mxu0 %v2844_v13 }
0x1105   :  { %1721 = vmatpush1.msra.mxu0 %v2847_v14 }
0x1106   :  { %1722 = vmatprep.subr.mxu0 %v2850_v15 }
0x1107   :  { %1723 = vmatpush1.msra.mxu0 %v2853_v16 }
0x1108   :  { %1724 = vmatprep.subr.mxu0 %v2856_v17 }
0x1109   :  { %1725 = vmatpush1.msra.mxu0 %v2859_v18 }
0x110a   :  { %1726 = vmatprep.subr.mxu0 %v2862_v19 }
0x110b   :  { %1727 = vmatpush1.msra.mxu0 %v2865_v46 }
0x110c   :  { %1728 = vmatprep.subr.mxu0 %v2868_v40 }
0x110d   :  { %1729 = vmatpush1.msra.mxu0 %v2871_v47 }
0x110e   :  { %1730 = vmatprep.subr.mxu0 %v2874_v53 }
0x110f   :  { %1731 = vmatpush1.msra.mxu0 %v2877_v1 }
0x1110   :  { %1732 = vmatprep.subr.mxu0 %v2881_v42 }
0x1111   :  { %1733 = vmatpush1.msra.mxu0 %v2884_v54 }
0x1112   :  { %1922 = vmatprep.subr.mxu0 %v2834_v4 }
0x11c2   :  { %v1564_v41 = vpop.f32.mrf.mxu0 }
0x11c3   :  { %v1569_v52 = vadd.f32 %v1564_v41, %v1226_v39 }
0x11c4   :  { %v1566_v56 = vpop.f32.mrf.mxu0 }
0x11c5   :  { %v2161_v55 = vmul.f32 -1.442695, %v1569_v52  ;;  %v1570_v43 = vadd.f32 %v1566_v56, %v1228_v57 }
0x11c7   :  { %2304 = vpow2.f32 %v2161_v55  ;;  %v2162_v63 = vmul.f32 -1.442695, %v1570_v43 }
0x11c8   :  { %2306 = vtanh.f32 %v1570_v43  ;;  %v1238_v43 = vadd.f32 %v2999_v38, %v2935_v59 }
0x11d4   :  { %v2305_v11 = vpop.eup %2304 }
0x11d5   :  { %v1574_v58 = vadd.f32 1.0, %v2305_v11  ;;  %v2307_v60 = vpop.eup %2306 }
0x11d7   :  { %2308 = vrcp.f32 %v1574_v58 }
0x11d8   :  { %2310 = vpow2.f32 %v2162_v63 }
0x11e4   :  { %v2309_v61 = vpop.eup %2308 }
0x11e5   :  { %v1585_v62 = vmul.f32 %v2309_v61, %v2307_v60  ;;  %v2311_v7 = vpop.eup %2310  ;;  %v1584_v10 = vmul.f32 %v2309_v61, %v1488_v30 }
0x11e6   :  { %v1581_v9 = vadd.f32 1.0, %v2311_v7 }
0x11e7   :  { %1587 = vrot.lane.b32.xlu0 %v1585_v62, %s2425_s3  ;;  %v1240_v62 = vadd.f32 %v3001_v2, %v2940_v23 }
0x11e8   :  { %2312 = vrcp.f32 %v1581_v9 }
0x11f5   :  { %v2313_v50 = vpop.eup %2312 }
0x1259   :  { %v1588_v20 = vpop.permute.xlu0 %1587 }
0x125a   :  { %v1590_v24 = vadd.f32 %v1588_v20, %v1584_v10 }
0x125c   :  { %2314 = vtanh.f32 %v1590_v24 }
0x1269   :  { %v2315_v22 = vpop.eup %2314 }
0x126a   :  { %v1592_v25 = vmul.f32 %v2315_v22, %v2313_v50 }
0x126c   :  { %1596 = vrot.lane.b32.xlu1 %v1592_v25, %s2425_s3 }
0x12de   :  { %v1597_v26 = vpop.permute.xlu1 %1596 }
0x12df   :  { %2163 = vmatmul.mubr.msk.f32.vlgmr.msra.gmra.mxu1 %vm255_vm2, %v1597_v26 }
0x12e0   :  { %1821 = vmatpush1.msra.mxu1 %v2842_v12  ;;  %1868 = vmatprep.mubr.f32.mxu1 %v2424_v0 }
0x12e1   :  { %1822 = vmatprep.subr.mxu1 %v2844_v13 }
0x12e2   :  { %1823 = vmatpush1.msra.mxu1 %v2847_v14 }
0x12e3   :  { %1824 = vmatprep.subr.mxu1 %v2850_v15 }
0x12e4   :  { %1825 = vmatpush1.msra.mxu1 %v2853_v16 }
0x12e5   :  { %1826 = vmatprep.subr.mxu1 %v2856_v17 }
0x12e6   :  { %1827 = vmatpush1.msra.mxu1 %v2859_v18 }
0x12e7   :  { %1828 = vmatprep.subr.mxu1 %v2862_v19 }
0x12e8   :  { %1829 = vmatpush1.msra.mxu1 %v2865_v46 }
0x12e9   :  { %1830 = vmatprep.subr.mxu1 %v2868_v40 }
0x12ea   :  { %1831 = vmatpush1.msra.mxu1 %v2871_v47 }
0x12eb   :  { %1832 = vmatprep.subr.mxu1 %v2874_v53 }
0x12ec   :  { %1833 = vmatpush1.msra.mxu1 %v2877_v1 }
0x12ed   :  { %1834 = vmatprep.subr.mxu1 %v2881_v42 }
0x12ee   :  { %1835 = vmatpush1.msra.mxu1 %v2884_v54 }
0x12ef   :  { %2024 = vmatprep.subr.mxu1 %v2834_v4 }
0x139f   :  { %v1666_v28 = vpop.f32.mrf.mxu1 }
0x13a0   :  { %v1671_v29 = vadd.f32 %v1666_v28, %v1232_v27 }
0x13a1   :  { %v1668_v32 = vpop.f32.mrf.mxu1 }
0x13a2   :  { %v2164_v44 = vmul.f32 -1.442695, %v1671_v29  ;;  %v1672_v30 = vadd.f32 %v1668_v32, %v1234_v21 }
0x13a4   :  { %2316 = vpow2.f32 %v2164_v44  ;;  %v2165_v4 = vmul.f32 -1.442695, %v1672_v30 }
0x13a5   :  { %2318 = vtanh.f32 %v1672_v30 }
0x13b1   :  { %v2317_v33 = vpop.eup %2316 }
0x13b2   :  { %v1676_v34 = vadd.f32 1.0, %v2317_v33  ;;  %v2319_v35 = vpop.eup %2318 }
0x13b4   :  { %2320 = vrcp.f32 %v1676_v34  ;;  %v1250_v34 = vadd.f32 %v3007_v5, %v2935_v59 }
0x13b5   :  { %2322 = vpow2.f32 %v2165_v4 }
0x13c1   :  { %v2321_v45 = vpop.eup %2320 }
0x13c2   :  { %v1687_v36 = vmul.f32 %v2321_v45, %v2319_v35  ;;  %v2323_v37 = vpop.eup %2322  ;;  %v1686_v39 = vmul.f32 %v2321_v45, %v1590_v24 }
0x13c3   :  { %v1683_v31 = vadd.f32 1.0, %v2323_v37  ;;  %v1252_v37 = vadd.f32 %v3009_v49, %v2940_v23 }
0x13c4   :  { %1689 = vrot.lane.b32.xlu0 %v1687_v36, %s2425_s3 }
0x13c5   :  { %2324 = vrcp.f32 %v1683_v31 }
0x13d2   :  { %v2325_v51 = vpop.eup %2324 }
0x1436   :  { %v1690_v41 = vpop.permute.xlu0 %1689 }
0x1437   :  { %v1692_v52 = vadd.f32 %v1690_v41, %v1686_v39 }
0x1439   :  { %2326 = vtanh.f32 %v1692_v52 }
0x1446   :  { %v2327_v55 = vpop.eup %2326 }
0x1447   :  { %v1694_v56 = vmul.f32 %v2327_v55, %v2325_v51 }
0x1449   :  { %1698 = vrot.lane.b32.xlu1 %v1694_v56, %s2425_s3 }
0x14bb   :  { %v1699_v57 = vpop.permute.xlu1 %1698 }
0x14bc   :  { %2166 = vmatmul.mubr.msk.f32.vlgmr.msra.gmra.mxu0 %vm255_vm2, %v1699_v57 }
0x14bd   :  { %1923 = vmatpush1.msra.mxu0 %v2842_v12  ;;  %1970 = vmatprep.mubr.f32.mxu0 %v2424_v0 }
0x14be   :  { %1924 = vmatprep.subr.mxu0 %v2844_v13 }
0x14bf   :  { %1925 = vmatpush1.msra.mxu0 %v2847_v14 }
0x14c0   :  { %1926 = vmatprep.subr.mxu0 %v2850_v15 }
0x14c1   :  { %1927 = vmatpush1.msra.mxu0 %v2853_v16 }
0x14c2   :  { %1928 = vmatprep.subr.mxu0 %v2856_v17 }
0x14c3   :  { %1929 = vmatpush1.msra.mxu0 %v2859_v18 }
0x14c4   :  { %1930 = vmatprep.subr.mxu0 %v2862_v19 }
0x14c5   :  { %1931 = vmatpush1.msra.mxu0 %v2865_v46 }
0x14c6   :  { %1932 = vmatprep.subr.mxu0 %v2868_v40 }
0x14c7   :  { %1933 = vmatpush1.msra.mxu0 %v2871_v47 }
0x14c8   :  { %1934 = vmatprep.subr.mxu0 %v2874_v53 }
0x14c9   :  { %1935 = vmatpush1.msra.mxu0 %v2877_v1 }
0x14ca   :  { %1936 = vmatprep.subr.mxu0 %v2881_v42 }
0x14cb   :  { %1937 = vmatpush1.msra.mxu0 %v2884_v54 }
0x157c   :  { %v1768_v11 = vpop.f32.mrf.mxu0 }
0x157d   :  { %v1773_v58 = vadd.f32 %v1768_v11, %v1238_v43 }
0x157e   :  { %v1770_v61 = vpop.f32.mrf.mxu0 }
0x157f   :  { %v2167_v60 = vmul.f32 -1.442695, %v1773_v58  ;;  %v1774_v63 = vadd.f32 %v1770_v61, %v1240_v62 }
0x1581   :  { %2328 = vpow2.f32 %v2167_v60  ;;  %v2168_v50 = vmul.f32 -1.442695, %v1774_v63 }
0x1582   :  { %2330 = vtanh.f32 %v1774_v63  ;;  %v1256_v63 = vadd.f32 %v3011_v6, %v2935_v59 }
0x158e   :  { %v2329_v7 = vpop.eup %2328 }
0x158f   :  { %v1778_v9 = vadd.f32 1.0, %v2329_v7  ;;  %v2331_v10 = vpop.eup %2330 }
0x1591   :  { %2332 = vrcp.f32 %v1778_v9 }
0x1592   :  { %2334 = vpow2.f32 %v2168_v50 }
0x159e   :  { %v2333_v20 = vpop.eup %2332 }
0x159f   :  { %v1789_v24 = vmul.f32 %v2333_v20, %v2331_v10  ;;  %v2335_v38 = vpop.eup %2334  ;;  %v1788_v25 = vmul.f32 %v2333_v20, %v1692_v52 }
0x15a0   :  { %v1785_v22 = vadd.f32 1.0, %v2335_v38 }
0x15a1   :  { %1791 = vrot.lane.b32.xlu0 %v1789_v24, %s2425_s3  ;;  %v1258_v24 = vadd.f32 %v3013_v8, %v2940_v23 }
0x15a2   :  { %2336 = vrcp.f32 %v1785_v22 }
0x15af   :  { %v2337_v2 = vpop.eup %2336 }
0x1613   :  { %v1792_v26 = vpop.permute.xlu0 %1791 }
0x1614   :  { %v1794_v27 = vadd.f32 %v1792_v26, %v1788_v25 }
0x1616   :  { %2338 = vtanh.f32 %v1794_v27 }
0x1623   :  { %v2339_v28 = vpop.eup %2338 }
0x1624   :  { %v1796_v29 = vmul.f32 %v2339_v28, %v2337_v2 }
0x1626   :  { %1800 = vrot.lane.b32.xlu1 %v1796_v29, %s2425_s3 }
0x1698   :  { %v1801_v44 = vpop.permute.xlu1 %1800 }
0x1699   :  { %2169 = vmatmul.mubr.msk.f32.vlgmr.msra.gmra.mxu1 %vm255_vm2, %v1801_v44 }
0x169a   :  { %2025 = vmatpush1.msra.mxu1 %v2842_v12  ;;  %2072 = vmatprep.mubr.f32.mxu1 %v2424_v0  ;;  %v1244_v0 = vadd.f32 %v3003_v3, %v2935_v59 }
0x169b   :  { %2026 = vmatprep.subr.mxu1 %v2844_v13 }
0x169c   :  { %2027 = vmatpush1.msra.mxu1 %v2847_v14 }
0x169d   :  { %2028 = vmatprep.subr.mxu1 %v2850_v15 }
0x169e   :  { %2029 = vmatpush1.msra.mxu1 %v2853_v16  ;;  %v1246_v16 = vadd.f32 %v3005_v48, %v2940_v23 }
0x169f   :  { %2030 = vmatprep.subr.mxu1 %v2856_v17 }
0x16a0   :  { %2031 = vmatpush1.msra.mxu1 %v2859_v18 }
0x16a1   :  { %2032 = vmatprep.subr.mxu1 %v2862_v19 }
0x16a2   :  { %2033 = vmatpush1.msra.mxu1 %v2865_v46 }
0x16a3   :  { %2034 = vmatprep.subr.mxu1 %v2868_v40 }
0x16a4   :  { %2035 = vmatpush1.msra.mxu1 %v2871_v47 }
0x16a5   :  { %2036 = vmatprep.subr.mxu1 %v2874_v53 }
0x16a6   :  { %2037 = vmatpush1.msra.mxu1 %v2877_v1 }
0x16a7   :  { %2038 = vmatprep.subr.mxu1 %v2881_v42 }
0x16a8   :  { %2039 = vmatpush1.msra.mxu1 %v2884_v54 }
0x1759   :  { %v1870_v12 = vpop.f32.mrf.mxu1 }
0x175a   :  { %v1875_v13 = vadd.f32 %v1870_v12, %v1244_v0 }
0x175b   :  { %v1872_v15 = vpop.f32.mrf.mxu1 }
0x175c   :  { %v2170_v14 = vmul.f32 -1.442695, %v1875_v13  ;;  %v1876_v17 = vadd.f32 %v1872_v15, %v1246_v16 }
0x175e   :  { %2340 = vpow2.f32 %v2170_v14  ;;  %v2171_v53 = vmul.f32 -1.442695, %v1876_v17 }
0x175f   :  { %2342 = vtanh.f32 %v1876_v17 }
0x176b   :  { %v2341_v18 = vpop.eup %2340 }
0x176c   :  { %v1880_v19 = vadd.f32 1.0, %v2341_v18  ;;  %v2343_v46 = vpop.eup %2342 }
0x176e   :  { %2344 = vrcp.f32 %v1880_v19 }
0x176f   :  { %2346 = vpow2.f32 %v2171_v53 }
0x177b   :  { %v2345_v40 = vpop.eup %2344 }
0x177c   :  { %v1891_v47 = vmul.f32 %v2345_v40, %v2343_v46  ;;  %v2347_v1 = vpop.eup %2346  ;;  %v1890_v54 = vmul.f32 %v2345_v40, %v1794_v27 }
0x177d   :  { %v1887_v42 = vadd.f32 1.0, %v2347_v1 }
0x177e   :  { %1893 = vrot.lane.b32.xlu0 %v1891_v47, %s2425_s3 }
0x177f   :  { %2348 = vrcp.f32 %v1887_v42 }
0x178c   :  { %v2349_v48 = vpop.eup %2348 }
0x17f0   :  { %v1894_v3 = vpop.permute.xlu0 %1893 }
0x17f1   :  { %v1896_v32 = vadd.f32 %v1894_v3, %v1890_v54 }
0x17f3   :  { %2350 = vtanh.f32 %v1896_v32 }
0x1800   :  { %v2351_v21 = vpop.eup %2350 }
0x1801   :  { %v1898_v30 = vmul.f32 %v2351_v21, %v2349_v48 }
0x1803   :  { %1902 = vrot.lane.b32.xlu1 %v1898_v30, %s2425_s3 }
0x1875   :  { %v1903_v33 = vpop.permute.xlu1 %1902 }
0x1876   :  { %2172 = vmatmul.mubr.msk.f32.vlgmr.msra.gmra.mxu0 %vm255_vm2, %v1903_v33 }
0x1936   :  { %v1972_v35 = vpop.f32.mrf.mxu0 }
0x1937   :  { %v1977_v45 = vadd.f32 %v1972_v35, %v1250_v34 }
0x1938   :  { %v1974_v4 = vpop.f32.mrf.mxu0 }
0x1939   :  { %v2173_v36 = vmul.f32 -1.442695, %v1977_v45  ;;  %v1978_v31 = vadd.f32 %v1974_v4, %v1252_v37 }
0x193b   :  { %2352 = vpow2.f32 %v2173_v36  ;;  %v2174_v56 = vmul.f32 -1.442695, %v1978_v31 }
0x193c   :  { %2354 = vtanh.f32 %v1978_v31 }
0x1948   :  { %v2353_v39 = vpop.eup %2352 }
0x1949   :  { %v1982_v41 = vadd.f32 1.0, %v2353_v39  ;;  %v2355_v52 = vpop.eup %2354 }
0x194b   :  { %2356 = vrcp.f32 %v1982_v41 }
0x194c   :  { %2358 = vpow2.f32 %v2174_v56 }
0x1958   :  { %v2357_v51 = vpop.eup %2356 }
0x1959   :  { %v1993_v55 = vmul.f32 %v2357_v51, %v2355_v52  ;;  %v2359_v5 = vpop.eup %2358  ;;  %v1992_v43 = vmul.f32 %v2357_v51, %v1896_v32 }
0x195a   :  { %v1989_v57 = vadd.f32 1.0, %v2359_v5 }
0x195b   :  { %1995 = vrot.lane.b32.xlu0 %v1993_v55, %s2425_s3 }
0x195c   :  { %2360 = vrcp.f32 %v1989_v57 }
0x1969   :  { %v2361_v49 = vpop.eup %2360 }
0x19cd   :  { %v1996_v11 = vpop.permute.xlu0 %1995 }
0x19ce   :  { %v1998_v58 = vadd.f32 %v1996_v11, %v1992_v43 }
0x19d0   :  { %2362 = vtanh.f32 %v1998_v58 }
0x19dd   :  { %v2363_v60 = vpop.eup %2362 }
0x19de   :  { %v2000_v61 = vmul.f32 %v2363_v60, %v2361_v49 }
0x19e0   :  { %2004 = vrot.lane.b32.xlu1 %v2000_v61, %s2425_s3 }
0x1a52   :  { %v2005_v62 = vpop.permute.xlu1 %2004 }
0x1a53   :  { %2175 = vmatmul.mubr.msk.f32.vlgmr.msra.gmra.mxu1 %vm255_vm2, %v2005_v62 }
0x1b13   :  { %v2074_v7 = vpop.f32.mrf.mxu1 }
0x1b14   :  { %v2079_v9 = vadd.f32 %v2074_v7, %v1256_v63 }
0x1b15   :  { %v2076_v20 = vpop.f32.mrf.mxu1 }
0x1b16   :  { %v2176_v10 = vmul.f32 -1.442695, %v2079_v9  ;;  %v2080_v50 = vadd.f32 %v2076_v20, %v1258_v24 }
0x1b18   :  { %2364 = vpow2.f32 %v2176_v10  ;;  %v2177_v2 = vmul.f32 -1.442695, %v2080_v50 }
0x1b19   :  { %2366 = vtanh.f32 %v2080_v50 }
0x1b25   :  { %v2365_v38 = vpop.eup %2364 }
0x1b26   :  { %v2084_v22 = vadd.f32 1.0, %v2365_v38  ;;  %v2367_v25 = vpop.eup %2366 }
0x1b28   :  { %2368 = vrcp.f32 %v2084_v22 }
0x1b29   :  { %2370 = vpow2.f32 %v2177_v2 }
0x1b35   :  { %v2369_v26 = vpop.eup %2368 }
0x1b36   :  { %v2095_v27 = vmul.f32 %v2369_v26, %v2367_v25  ;;  %v2371_v59 = vpop.eup %2370  ;;  %v2094_v28 = vmul.f32 %v2369_v26, %v1998_v58 }
0x1b37   :  { %v2091_v6 = vadd.f32 1.0, %v2371_v59 }
0x1b38   :  { %2097 = vrot.lane.b32.xlu0 %v2095_v27, %s2425_s3 }
0x1b39   :  { %2372 = vrcp.f32 %v2091_v6 }
0x1b46   :  { %v2373_v23 = vpop.eup %2372 }
0x1baa   :  { %v2098_v29 = vpop.permute.xlu0 %2097 }
0x1bab   :  { %v2100_v44 = vadd.f32 %v2098_v29, %v2094_v28 }
0x1bad   :  { %2374 = vtanh.f32 %v2100_v44 }
0x1bba   :  { %v2375_v8 = vpop.eup %2374 }
0x1bbb   :  { %v2102_v0 = vmul.f32 %v2375_v8, %v2373_v23 }
0x1bbd   :  { %2104 = vrot.lane.b32.xlu1 %v2102_v0, %s2425_s3 }
0x1c2f   :  { %v2105_v12 = vpop.permute.xlu1 %2104 }
0x1c30   :  { %2107 = vst.msk [vmem:[%s3113_s7] sm:$0xff] %vm255_vm2, %v2105_v12 }
0x1c31   :  { %2112 = vsyncpa [#allocation6], 1 }
0x1c32   :  { %2113 = vsyncpa [#allocation8], 1 }

</bundles_post_ra>
